<compile_context>
chip_gen: v7x
topology: tpu7x:2x2x1
jax: 0.10.0
libtpu: 0.0.40
codegen_flags: <defaults>
</compile_context>

<pallas_src>
import functools

import jax
import jax.numpy as jnp
from jax.experimental import pallas as pl
from jax.experimental.pallas import tpu as pltpu


def _round_up(x, m):
    return ((x + m - 1) // m) * m


def _pick_tile(dim, targets):
    for t in targets:
        if dim % t == 0:
            return t
    return dim


def _pick_chunk(T, target=32):
    for c in range(min(T, target), 0, -1):
        if T % c == 0:
            return c
    return 1


# ---------------------------------------------------------------------------
# Tiled matmul + bias:  out = x @ w + b   (bf16 operands, f32 accumulate)
# Grid is (N, M, K) so, when K fits one tile, each (K, tn) weight tile is
# fetched from HBM once and reused across all M tiles (block index unchanged).
# ---------------------------------------------------------------------------
def _matmul_bias_kernel(x_ref, w_ref, b_ref, o_ref, acc_ref):
    @pl.when(pl.program_id(2) == 0)
    def _():
        acc_ref[...] = jnp.zeros_like(acc_ref)

    acc_ref[...] += jnp.dot(x_ref[...], w_ref[...],
                            preferred_element_type=jnp.float32)

    @pl.when(pl.program_id(2) == pl.num_programs(2) - 1)
    def _():
        o_ref[...] = (acc_ref[...] + b_ref[...]).astype(o_ref.dtype)


def matmul_bias(x, w, b):
    """x: (M, K) bf16; w: (K, N) bf16 (pre-transposed); b: (N,) f32 -> (M, N) f32."""
    M, K = x.shape
    Kw, N = w.shape
    assert K == Kw
    tm = _pick_tile(M, (512, 256, 128, 64, 32, 16, 8))
    tn = _pick_tile(N, (512, 256, 128))
    tk = _pick_tile(K, (2048, 1024, 512, 256, 128))
    b2 = b.reshape(1, N).astype(jnp.float32)

    return pl.pallas_call(
        _matmul_bias_kernel,
        out_shape=jax.ShapeDtypeStruct((M, N), jnp.float32),
        grid_spec=pltpu.PrefetchScalarGridSpec(
            num_scalar_prefetch=0,
            grid=(N // tn, M // tm, K // tk),            # N outer, M inner -> weight reuse
            in_specs=[
                pl.BlockSpec((tm, tk), lambda j, i, k: (i, k)),
                pl.BlockSpec((tk, tn), lambda j, i, k: (k, j)),
                pl.BlockSpec((1, tn), lambda j, i, k: (0, j)),
            ],
            out_specs=pl.BlockSpec((tm, tn), lambda j, i, k: (i, j)),
            scratch_shapes=[pltpu.VMEM((tm, tn), jnp.float32)],
        ),
        compiler_params=pltpu.CompilerParams(
            dimension_semantics=("parallel", "parallel", "arbitrary"),
            vmem_limit_bytes=48 * 1024 * 1024,
        ),
    )(x, w, b2)


# ---------------------------------------------------------------------------
# Fused multi-layer LSTM recurrence, grid = (batch_slabs, time_chunks).
#   emb      : (T, Bp, Ep)  bf16 embedded inputs
#   w_ih0    : (Ep, 4Hp)    bf16, HBM (copied once into VMEM scratch)
#   w_ih_rest: (max(L-1,1), Hp, 4Hp) bf16, HBM
#   w_hh     : (L, Hp, 4Hp) bf16, HBM
#   h0, c0   : (L, Bp, Hp)  f32
# Outputs: y (T, Bp, Hp) bf16 top-layer states, hn/cn (L, Bp, Hp) f32.
# ---------------------------------------------------------------------------
def _lstm_stack_kernel(emb_ref, wih0_hbm, wihr_hbm, whh_hbm, h0_ref, c0_ref,
                       y_ref, hn_ref, cn_ref,
                       wih0_sc, wihr_sc, whh_sc, h_sc, c_sc, xg_sc,
                       *, num_layers):
    L = num_layers
    Tc, Bs, G = xg_sc.shape
    Hp = G // 4
    Ep = emb_ref.shape[-1]
    chunk_idx = pl.program_id(1)

    @pl.when(chunk_idx == 0)
    def _():
        # Single-buffered weights: copy HBM -> persistent VMEM scratch once per slab.
        pltpu.sync_copy(wih0_hbm, wih0_sc)
        pltpu.sync_copy(wihr_hbm, wihr_sc)
        pltpu.sync_copy(whh_hbm, whh_sc)
        h_sc[...] = h0_ref[...]
        c_sc[...] = c0_ref[...]

    # Layer-0 x-side gates: one MXU matmul over the whole chunk.
    xg_sc[...] = jnp.dot(emb_ref[...].reshape(Tc * Bs, Ep), wih0_sc[...],
                         preferred_element_type=jnp.float32).reshape(Tc, Bs, G)

    def run_layer(layer):
        # h/c carried in registers across the (unrolled) time loop; flushed once at the end.
        def step(t, carry):
            h, c = carry
            gates = xg_sc[t] + jnp.dot(h.astype(jnp.bfloat16), whh_sc[layer],
                                       preferred_element_type=jnp.float32)
            i_g = jax.nn.sigmoid(gates[:, 0 * Hp:1 * Hp])
            f_g = jax.nn.sigmoid(gates[:, 1 * Hp:2 * Hp])
            g_g = jnp.tanh(gates[:, 2 * Hp:3 * Hp])
            o_g = jax.nn.sigmoid(gates[:, 3 * Hp:4 * Hp])
            c_new = f_g * c + i_g * g_g
            h_new = o_g * jnp.tanh(c_new)
            y_ref[t] = h_new.astype(y_ref.dtype)
            return h_new, c_new

        h_f, c_f = jax.lax.fori_loop(0, Tc, step, (h_sc[layer], c_sc[layer]),
                                     unroll=True)
        h_sc[layer] = h_f
        c_sc[layer] = c_f

    run_layer(0)

    for layer in range(1, L):
        # Hoisted x-side projection for this layer over the whole chunk (reads bf16 y in VMEM).
        xg_sc[...] = jnp.dot(y_ref[...].reshape(Tc * Bs, Hp), wihr_sc[layer - 1],
                             preferred_element_type=jnp.float32).reshape(Tc, Bs, G)
        run_layer(layer)

    @pl.when(chunk_idx == pl.num_programs(1) - 1)
    def _():
        hn_ref[...] = h_sc[...]
        cn_ref[...] = c_sc[...]


def lstm_stack(emb, w_ih0, w_ih_rest, w_hh, h0, c0, *, time_chunk, batch_slabs):
    T, Bp, Ep = emb.shape
    L, _, Hp = h0.shape
    Lr = w_ih_rest.shape[0]
    G = 4 * Hp
    Tc = time_chunk
    Bs = Bp // batch_slabs
    assert T % Tc == 0 and Bp % batch_slabs == 0

    kernel = functools.partial(_lstm_stack_kernel, num_layers=L)

    y, hn, cn = pl.pallas_call(
        kernel,
        out_shape=(
            jax.ShapeDtypeStruct((T, Bp, Hp), jnp.bfloat16),
            jax.ShapeDtypeStruct((L, Bp, Hp), jnp.float32),
            jax.ShapeDtypeStruct((L, Bp, Hp), jnp.float32),
        ),
        grid_spec=pltpu.PrefetchScalarGridSpec(
            num_scalar_prefetch=0,
            grid=(batch_slabs, T // Tc),
            in_specs=[
                pl.BlockSpec((Tc, Bs, Ep), lambda b, c: (c, b, 0)),   # embedded inputs (pipelined)
                pl.BlockSpec(memory_space=pl.ANY),                    # W_ih layer 0 (HBM)
                pl.BlockSpec(memory_space=pl.ANY),                    # W_ih layers 1..L-1 (HBM)
                pl.BlockSpec(memory_space=pl.ANY),                    # W_hh (HBM)
                pl.BlockSpec((L, Bs, Hp), lambda b, c: (0, b, 0)),    # h0
                pl.BlockSpec((L, Bs, Hp), lambda b, c: (0, b, 0)),    # c0
            ],
            out_specs=[
                pl.BlockSpec((Tc, Bs, Hp), lambda b, c: (c, b, 0)),   # per-chunk top-layer output
                pl.BlockSpec((L, Bs, Hp), lambda b, c: (0, b, 0)),    # final h (last chunk)
                pl.BlockSpec((L, Bs, Hp), lambda b, c: (0, b, 0)),    # final c (last chunk)
            ],
            scratch_shapes=[
                pltpu.VMEM((Ep, G), jnp.bfloat16),                    # resident W_ih0
                pltpu.VMEM((Lr, Hp, G), jnp.bfloat16),                # resident W_ih 1..L-1
                pltpu.VMEM((L, Hp, G), jnp.bfloat16),                 # resident W_hh
                pltpu.VMEM((L, Bs, Hp), jnp.float32),                 # h carry
                pltpu.VMEM((L, Bs, Hp), jnp.float32),                 # c carry
                pltpu.VMEM((Tc, Bs, G), jnp.float32),                 # hoisted x-gates
            ],
        ),
        compiler_params=pltpu.CompilerParams(
            dimension_semantics=("parallel", "arbitrary"),            # batch slabs || , time serial
            vmem_limit_bytes=48 * 1024 * 1024,
        ),
    )(emb, w_ih0, w_ih_rest, w_hh, h0, c0)
    return y, hn, cn


# ---------------------------------------------------------------------------
# Parameters: bf16, pre-transposed, padded to lane-aligned dims (E,H,V -> x128).
# Gate columns are padded per gate block so the PyTorch (i,f,g,o) layout survives padding.
# ---------------------------------------------------------------------------
def _pad_gate_cols(w, H, Hp):
    in_dim = w.shape[0]
    w4 = w.reshape(in_dim, 4, H)
    w4 = jnp.pad(w4, ((0, 0), (0, 0), (0, Hp - H)))
    return w4.reshape(in_dim, 4 * Hp)


def init_params(key, vocab_size, emb_size, hidden_size, num_layers,
                init_weight_range=0.1):
    V, E, H, L = vocab_size, emb_size, hidden_size, num_layers
    Vp, Ep, Hp = _round_up(V, 128), _round_up(E, 128), _round_up(H, 128)
    keys = jax.random.split(key, 2 + 2 * L)
    params = {}

    embed = jax.random.uniform(keys[0], (V, E), jnp.float32,
                               -init_weight_range, init_weight_range)
    params["embed"] = jnp.pad(embed, ((0, 0), (0, Ep - E)))            # (V, Ep) f32

    proj_w = jax.random.uniform(keys[1], (H, V), jnp.float32,
                                -init_weight_range, init_weight_range)
    params["proj_w_t"] = jnp.pad(proj_w, ((0, Hp - H), (0, Vp - V))).astype(jnp.bfloat16)
    params["proj_b"] = jnp.zeros((Vp,), jnp.float32)

    bound = 1.0 / float(H) ** 0.5
    whh_list, wihr_list = [], []
    for layer in range(L):
        in_dim = E if layer == 0 else H
        in_pad = Ep if layer == 0 else Hp
        w_ih = jax.random.uniform(keys[2 + 2 * layer], (in_dim, 4 * H),
                                  jnp.float32, -bound, bound)
        w_hh = jax.random.uniform(keys[3 + 2 * layer], (H, 4 * H),
                                  jnp.float32, -bound, bound)
        w_ih_p = jnp.pad(_pad_gate_cols(w_ih, H, Hp),
                         ((0, in_pad - in_dim), (0, 0))).astype(jnp.bfloat16)
        w_hh_p = jnp.pad(_pad_gate_cols(w_hh, H, Hp),
                         ((0, Hp - H), (0, 0))).astype(jnp.bfloat16)
        if layer == 0:
            params["w_ih0_t"] = w_ih_p                                  # (Ep, 4Hp)
        else:
            wihr_list.append(w_ih_p)                                    # (Hp, 4Hp)
        whh_list.append(w_hh_p)
    params["w_hh_t"] = jnp.stack(whh_list)                              # (L, Hp, 4Hp)
    params["w_ih_rest_t"] = (jnp.stack(wihr_list) if wihr_list
                             else jnp.zeros((1, Hp, 4 * Hp), jnp.bfloat16))
    return params


# ---------------------------------------------------------------------------
# Full RNNLM forward
# ---------------------------------------------------------------------------
def rnnlm_forward(params, inp, hidden, *, time_chunk=None):
    """inp: (T, B) int32; hidden: ((L,B,H), (L,B,H)) f32. Returns (logits (T,B,V), hidden)."""
    h0, c0 = hidden
    T, B = inp.shape
    L, _, H = h0.shape
    V = params["embed"].shape[0]
    Hp = params["w_hh_t"].shape[1]
    Vp = params["proj_w_t"].shape[1]

    # TODO(synk): dropout p=0.0 -> identity; embedding gather left as plain-JAX glue.
    emb = jnp.take(params["embed"], inp, axis=0).astype(jnp.bfloat16)   # (T, B, Ep) bf16

    B_pad = _round_up(B, 8)
    emb = jnp.pad(emb, ((0, 0), (0, B_pad - B), (0, 0)))
    h0_p = jnp.pad(h0, ((0, 0), (0, B_pad - B), (0, Hp - H)))
    c0_p = jnp.pad(c0, ((0, 0), (0, B_pad - B), (0, Hp - H)))

    Tc = time_chunk if time_chunk is not None else _pick_chunk(T, 32)
    if T % Tc != 0:
        Tc = _pick_chunk(T, Tc)
    # Split batch into 2 slabs (parallel grid axis -> 2 TensorCores on v7x) when it is
    # large enough to keep bf16 blocks (16,128)-aligned; harmless sequential loop otherwise.
    n_slabs = 2 if B_pad % 32 == 0 else 1

    y_p, hn_p, cn_p = lstm_stack(emb, params["w_ih0_t"], params["w_ih_rest_t"],
                                 params["w_hh_t"], h0_p, c0_p,
                                 time_chunk=Tc, batch_slabs=n_slabs)

    # Projection on the padded batch; slice logits at the very end.
    logits_p = matmul_bias(y_p.reshape(T * B_pad, Hp),
                           params["proj_w_t"], params["proj_b"])
    logits = logits_p.reshape(T, B_pad, Vp)[:, :B, :V]
    return logits, (hn_p[:, :B, :H], cn_p[:, :B, :H])


# ---------------------------------------------------------------------------
# Pure-JAX reference (same bf16 matmul-operand casts, f32 accumulate/gates)
# ---------------------------------------------------------------------------
def _rnnlm_reference(params, inp, hidden):
    h0_all, c0_all = hidden
    T, B = inp.shape
    L, _, H = h0_all.shape
    V = params["embed"].shape[0]
    Hp = params["w_hh_t"].shape[1]

    x = jnp.take(params["embed"], inp, axis=0).astype(jnp.bfloat16)     # (T, B, Ep)
    h0p = jnp.pad(h0_all, ((0, 0), (0, 0), (0, Hp - H)))
    c0p = jnp.pad(c0_all, ((0, 0), (0, 0), (0, Hp - H)))

    hs, cs = [], []
    for layer in range(L):
        w_ih = params["w_ih0_t"] if layer == 0 else params["w_ih_rest_t"][layer - 1]
        w_hh = params["w_hh_t"][layer]

        def step(carry, x_t, w_ih=w_ih, w_hh=w_hh):
            h, c = carry
            gates = (jnp.dot(x_t, w_ih, preferred_element_type=jnp.float32)
                     + jnp.dot(h.astype(jnp.bfloat16), w_hh,
                               preferred_element_type=jnp.float32))
            i = jax.nn.sigmoid(gates[:, 0 * Hp:1 * Hp])
            f = jax.nn.sigmoid(gates[:, 1 * Hp:2 * Hp])
            g = jnp.tanh(gates[:, 2 * Hp:3 * Hp])
            o = jax.nn.sigmoid(gates[:, 3 * Hp:4 * Hp])
            c = f * c + i * g
            h = o * jnp.tanh(c)
            return (h, c), h.astype(jnp.bfloat16)

        (h_f, c_f), ys = jax.lax.scan(step, (h0p[layer], c0p[layer]), x)
        x = ys
        hs.append(h_f[:, :H])
        cs.append(c_f[:, :H])

    logits = (jnp.dot(x.reshape(T * B, Hp), params["proj_w_t"],
                      preferred_element_type=jnp.float32)
              + params["proj_b"]).reshape(T, B, -1)[:, :, :V]
    return logits, (jnp.stack(hs), jnp.stack(cs))


if __name__ == "__main__":
    vocab_size, emb_size, hidden_size, num_layers = 64, 32, 32, 2
    T, B = 8, 2

    key = jax.random.PRNGKey(0)
    k_param, k_inp = jax.random.split(key)

    params = init_params(k_param, vocab_size, emb_size, hidden_size, num_layers)
    inp = jax.random.randint(k_inp, (T, B), 0, vocab_size, dtype=jnp.int32)
    hidden = (jnp.zeros((num_layers, B, hidden_size), jnp.float32),
              jnp.zeros((num_layers, B, hidden_size), jnp.float32))

    fwd = jax.jit(rnnlm_forward, static_argnames=("time_chunk",))

    # ---- test 1: single batch slab, 2 time chunks (exercises VMEM h/c carry) ----
    logits, (h_n, c_n) = fwd(params, inp, hidden, time_chunk=4)
    jax.block_until_ready((logits, h_n, c_n))
    assert logits.shape == (T, B, vocab_size)
    assert h_n.shape == (num_layers, B, hidden_size)
    assert c_n.shape == (num_layers, B, hidden_size)

    ref_logits, (ref_h, ref_c) = _rnnlm_reference(params, inp, hidden)
    assert jnp.allclose(logits, ref_logits, atol=5e-3, rtol=5e-3)
    assert jnp.allclose(h_n, ref_h, atol=5e-3, rtol=5e-3)
    assert jnp.allclose(c_n, ref_c, atol=5e-3, rtol=5e-3)

    # ---- test 2: larger batch -> 2 batch slabs (parallel grid axis), nonzero state ----
    B2 = 32
    k_h2, k_c2, k_i2 = jax.random.split(jax.random.PRNGKey(1), 3)
    inp2 = jax.random.randint(k_i2, (T, B2), 0, vocab_size, dtype=jnp.int32)
    hidden2 = (jax.random.uniform(k_h2, (num_layers, B2, hidden_size), jnp.float32, -0.1, 0.1),
               jax.random.uniform(k_c2, (num_layers, B2, hidden_size), jnp.float32, -0.1, 0.1))
    logits2, (h_n2, c_n2) = fwd(params, inp2, hidden2, time_chunk=4)
    jax.block_until_ready((logits2, h_n2, c_n2))
    ref_logits2, (ref_h2, ref_c2) = _rnnlm_reference(params, inp2, hidden2)
    assert jnp.allclose(logits2, ref_logits2, atol=5e-3, rtol=5e-3)
    assert jnp.allclose(h_n2, ref_h2, atol=5e-3, rtol=5e-3)
    assert jnp.allclose(c_n2, ref_c2, atol=5e-3, rtol=5e-3)

    print("KERNEL_OK")
</pallas_src>

<mosaic_0001>
module attributes {stable_mosaic.version = 11 : i64} {
  func.func @_matmul_bias_kernel(%arg0: i32, %arg1: i32, %arg2: i32, %arg3: memref<64x128xbf16, #tpu.memory_space<vmem>>, %arg4: memref<128x128xbf16, #tpu.memory_space<vmem>>, %arg5: memref<1x128xf32, #tpu.memory_space<vmem>>, %arg6: memref<64x128xf32, #tpu.memory_space<vmem>>, %arg7: memref<64x128xf32, #tpu.memory_space<vmem>>) attributes {dimension_semantics = [#tpu.dimension_semantics<parallel>, #tpu.dimension_semantics<parallel>, #tpu.dimension_semantics<arbitrary>], iteration_bounds = array<i64: 1, 1, 1>, scalar_prefetch = 0 : i64, scratch_operands = 1 : i64, tpu.core_type = #tpu.core_type<tc>, window_params = [{transform_indices = @transform_0, window_bounds = array<i64: 64, 128>}, {transform_indices = @transform_1, window_bounds = array<i64: 128, 128>}, {transform_indices = @transform_2, window_bounds = array<i64: 1, 128>}, {transform_indices = @transform_3, window_bounds = array<i64: 64, 128>}]} {
    %c0_i32 = arith.constant 0 : i32
    %0 = arith.cmpi eq, %arg2, %c0_i32 : i32
    %1 = arith.extui %0 : i1 to i32
    %c0_i32_0 = arith.constant 0 : i32
    %2 = arith.cmpi ne, %1, %c0_i32_0 : i32
    scf.if %2 {
      %cst_10 = arith.constant 0.000000e+00 : f32
      %12 = vector.broadcast %cst_10 : f32 to vector<64x128xf32>
      %c0_11 = arith.constant 0 : index
      %c0_12 = arith.constant 0 : index
      %13 = vector.load %arg7[%c0_11, %c0_12] : memref<64x128xf32, #tpu.memory_space<vmem>>, vector<64x128xf32>
      tpu.vector_store %arg7[%c0_11, %c0_12], %12 {strides = array<i32>} : memref<64x128xf32, #tpu.memory_space<vmem>>, vector<64x128xf32>,
    } else {
    }
    %c0 = arith.constant 0 : index
    %c0_1 = arith.constant 0 : index
    %3 = vector.load %arg7[%c0, %c0_1] : memref<64x128xf32, #tpu.memory_space<vmem>>, vector<64x128xf32>
    %c0_2 = arith.constant 0 : index
    %c0_3 = arith.constant 0 : index
    %4 = vector.load %arg3[%c0_2, %c0_3] : memref<64x128xbf16, #tpu.memory_space<vmem>>, vector<64x128xbf16>
    %c0_4 = arith.constant 0 : index
    %c0_5 = arith.constant 0 : index
    %5 = vector.load %arg4[%c0_4, %c0_5] : memref<128x128xbf16, #tpu.memory_space<vmem>>, vector<128x128xbf16>
    %cst = arith.constant dense<0.000000e+00> : vector<64x128xf32>
    %6 = tpu.matmul %4, %5, %cst {dimension_numbers = #tpu.dot_dimension_numbers<[1], [0], [0], [1], [0, 0, 1, 1], [], []>} : vector<64x128xbf16>, vector<128x128xbf16>, vector<64x128xf32> -> vector<64x128xf32>
    %7 = arith.addf %3, %6 : vector<64x128xf32>
    %c0_6 = arith.constant 0 : index
    %c0_7 = arith.constant 0 : index
    %8 = vector.load %arg7[%c0_6, %c0_7] : memref<64x128xf32, #tpu.memory_space<vmem>>, vector<64x128xf32>
    tpu.vector_store %arg7[%c0_6, %c0_7], %7 {strides = array<i32>} : memref<64x128xf32, #tpu.memory_space<vmem>>, vector<64x128xf32>,
    %c0_i32_8 = arith.constant 0 : i32
    %9 = arith.cmpi eq, %arg2, %c0_i32_8 : i32
    %10 = arith.extui %9 : i1 to i32
    %c0_i32_9 = arith.constant 0 : i32
    %11 = arith.cmpi ne, %10, %c0_i32_9 : i32
    scf.if %11 {
      %c0_10 = arith.constant 0 : index
      %c0_11 = arith.constant 0 : index
      %12 = vector.load %arg7[%c0_10, %c0_11] : memref<64x128xf32, #tpu.memory_space<vmem>>, vector<64x128xf32>
      %c0_12 = arith.constant 0 : index
      %c0_13 = arith.constant 0 : index
      %13 = vector.load %arg5[%c0_12, %c0_13] : memref<1x128xf32, #tpu.memory_space<vmem>>, vector<1x128xf32>
      %14 = vector.broadcast %13 : vector<1x128xf32> to vector<64x128xf32>
      %15 = arith.addf %12, %14 : vector<64x128xf32>
      %c0_14 = arith.constant 0 : index
      %c0_15 = arith.constant 0 : index
      %16 = vector.load %arg6[%c0_14, %c0_15] : memref<64x128xf32, #tpu.memory_space<vmem>>, vector<64x128xf32>
      tpu.vector_store %arg6[%c0_14, %c0_15], %15 {strides = array<i32>} : memref<64x128xf32, #tpu.memory_space<vmem>>, vector<64x128xf32>,
    } else {
    }
    return
  }
  func.func @transform_0(%arg0: i32, %arg1: i32, %arg2: i32) -> (i32, i32) {
    %c0_i32 = arith.constant 0 : i32
    return %arg1, %arg2 : i32, i32
  }
  func.func @transform_1(%arg0: i32, %arg1: i32, %arg2: i32) -> (i32, i32) {
    %c0_i32 = arith.constant 0 : i32
    return %arg2, %arg0 : i32, i32
  }
  func.func @transform_2(%arg0: i32, %arg1: i32, %arg2: i32) -> (i32, i32) {
    %c0_i32 = arith.constant 0 : i32
    %c0_i32_0 = arith.constant 0 : i32
    return %c0_i32, %arg0 : i32, i32
  }
  func.func @transform_3(%arg0: i32, %arg1: i32, %arg2: i32) -> (i32, i32) {
    %c0_i32 = arith.constant 0 : i32
    return %arg1, %arg0 : i32, i32
  }
}

module attributes {stable_mosaic.version = 11 : i64} {
  func.func @_lstm_stack_kernel(%arg0: i32, %arg1: i32, %arg2: memref<4x8x128xbf16, #tpu.memory_space<vmem>>, %arg3: memref<128x512xbf16, #tpu.memory_space<any>>, %arg4: memref<1x128x512xbf16, #tpu.memory_space<any>>, %arg5: memref<2x128x512xbf16, #tpu.memory_space<any>>, %arg6: memref<2x8x128xf32, #tpu.memory_space<vmem>>, %arg7: memref<2x8x128xf32, #tpu.memory_space<vmem>>, %arg8: memref<4x8x128xbf16, #tpu.memory_space<vmem>>, %arg9: memref<2x8x128xf32, #tpu.memory_space<vmem>>, %arg10: memref<2x8x128xf32, #tpu.memory_space<vmem>>, %arg11: memref<128x512xbf16, #tpu.memory_space<vmem>>, %arg12: memref<1x128x512xbf16, #tpu.memory_space<vmem>>, %arg13: memref<2x128x512xbf16, #tpu.memory_space<vmem>>, %arg14: memref<2x8x128xf32, #tpu.memory_space<vmem>>, %arg15: memref<2x8x128xf32, #tpu.memory_space<vmem>>, %arg16: memref<4x8x512xf32, #tpu.memory_space<vmem>>) attributes {dimension_semantics = [#tpu.dimension_semantics<parallel>, #tpu.dimension_semantics<arbitrary>], iteration_bounds = array<i64: 1, 2>, scalar_prefetch = 0 : i64, scratch_operands = 6 : i64, tpu.core_type = #tpu.core_type<tc>, window_params = [{transform_indices = @transform_0, window_bounds = array<i64: 4, 8, 128>}, {}, {}, {}, {transform_indices = @transform_4, window_bounds = array<i64: 2, 8, 128>}, {transform_indices = @transform_5, window_bounds = array<i64: 2, 8, 128>}, {transform_indices = @transform_6, window_bounds = array<i64: 4, 8, 128>}, {transform_indices = @transform_7, window_bounds = array<i64: 2, 8, 128>}, {transform_indices = @transform_8, window_bounds = array<i64: 2, 8, 128>}]} {
    %c0_i32 = arith.constant 0 : i32
    %0 = arith.cmpi eq, %arg1, %c0_i32 : i32
    %1 = arith.extui %0 : i1 to i32
    %c0_i32_0 = arith.constant 0 : i32
    %2 = arith.cmpi ne, %1, %c0_i32_0 : i32
    scf.if %2 {
      "tpu.region"() ({
        %347 = tpu.sem_alloc : memref<!tpu.dma_semaphore, #tpu.memory_space<semaphore_mem>>
        tpu.enqueue_dma source(%arg3 : memref<128x512xbf16, #tpu.memory_space<any>>) target(%arg11 : memref<128x512xbf16, #tpu.memory_space<vmem>>) target_semaphore(%347 : memref<!tpu.dma_semaphore, #tpu.memory_space<semaphore_mem>>)
        tpu.wait_dma2 semaphore(%347 : memref<!tpu.dma_semaphore, #tpu.memory_space<semaphore_mem>>) src(%arg3 : memref<128x512xbf16, #tpu.memory_space<any>>) dst(%arg11 : memref<128x512xbf16, #tpu.memory_space<vmem>>)
        tpu.yield
      }) : () -> ()
      "tpu.region"() ({
        %347 = tpu.sem_alloc : memref<!tpu.dma_semaphore, #tpu.memory_space<semaphore_mem>>
        tpu.enqueue_dma source(%arg4 : memref<1x128x512xbf16, #tpu.memory_space<any>>) target(%arg12 : memref<1x128x512xbf16, #tpu.memory_space<vmem>>) target_semaphore(%347 : memref<!tpu.dma_semaphore, #tpu.memory_space<semaphore_mem>>)
        tpu.wait_dma2 semaphore(%347 : memref<!tpu.dma_semaphore, #tpu.memory_space<semaphore_mem>>) src(%arg4 : memref<1x128x512xbf16, #tpu.memory_space<any>>) dst(%arg12 : memref<1x128x512xbf16, #tpu.memory_space<vmem>>)
        tpu.yield
      }) : () -> ()
      "tpu.region"() ({
        %347 = tpu.sem_alloc : memref<!tpu.dma_semaphore, #tpu.memory_space<semaphore_mem>>
        tpu.enqueue_dma source(%arg5 : memref<2x128x512xbf16, #tpu.memory_space<any>>) target(%arg13 : memref<2x128x512xbf16, #tpu.memory_space<vmem>>) target_semaphore(%347 : memref<!tpu.dma_semaphore, #tpu.memory_space<semaphore_mem>>)
        tpu.wait_dma2 semaphore(%347 : memref<!tpu.dma_semaphore, #tpu.memory_space<semaphore_mem>>) src(%arg5 : memref<2x128x512xbf16, #tpu.memory_space<any>>) dst(%arg13 : memref<2x128x512xbf16, #tpu.memory_space<vmem>>)
        tpu.yield
      }) : () -> ()
      %c0_137 = arith.constant 0 : index
      %c0_138 = arith.constant 0 : index
      %c0_139 = arith.constant 0 : index
      %343 = vector.load %arg6[%c0_137, %c0_138, %c0_139] : memref<2x8x128xf32, #tpu.memory_space<vmem>>, vector<2x8x128xf32>
      %c0_140 = arith.constant 0 : index
      %c0_141 = arith.constant 0 : index
      %c0_142 = arith.constant 0 : index
      %344 = vector.load %arg14[%c0_140, %c0_141, %c0_142] : memref<2x8x128xf32, #tpu.memory_space<vmem>>, vector<2x8x128xf32>
      tpu.vector_store %arg14[%c0_140, %c0_141, %c0_142], %343 {strides = array<i32>} : memref<2x8x128xf32, #tpu.memory_space<vmem>>, vector<2x8x128xf32>,
      %c0_143 = arith.constant 0 : index
      %c0_144 = arith.constant 0 : index
      %c0_145 = arith.constant 0 : index
      %345 = vector.load %arg7[%c0_143, %c0_144, %c0_145] : memref<2x8x128xf32, #tpu.memory_space<vmem>>, vector<2x8x128xf32>
      %c0_146 = arith.constant 0 : index
      %c0_147 = arith.constant 0 : index
      %c0_148 = arith.constant 0 : index
      %346 = vector.load %arg15[%c0_146, %c0_147, %c0_148] : memref<2x8x128xf32, #tpu.memory_space<vmem>>, vector<2x8x128xf32>
      tpu.vector_store %arg15[%c0_146, %c0_147, %c0_148], %345 {strides = array<i32>} : memref<2x8x128xf32, #tpu.memory_space<vmem>>, vector<2x8x128xf32>,
    } else {
    }
    %c0 = arith.constant 0 : index
    %c0_1 = arith.constant 0 : index
    %c0_2 = arith.constant 0 : index
    %3 = vector.load %arg2[%c0, %c0_1, %c0_2] : memref<4x8x128xbf16, #tpu.memory_space<vmem>>, vector<4x8x128xbf16>
    %4 = vector.shape_cast %3 : vector<4x8x128xbf16> to vector<32x128xbf16>
    %c0_3 = arith.constant 0 : index
    %c0_4 = arith.constant 0 : index
    %5 = vector.load %arg11[%c0_3, %c0_4] : memref<128x512xbf16, #tpu.memory_space<vmem>>, vector<128x512xbf16>
    %cst = arith.constant dense<0.000000e+00> : vector<32x512xf32>
    %6 = tpu.matmul %4, %5, %cst {dimension_numbers = #tpu.dot_dimension_numbers<[1], [0], [0], [1], [0, 0, 1, 1], [], []>} : vector<32x128xbf16>, vector<128x512xbf16>, vector<32x512xf32> -> vector<32x512xf32>
    %7 = vector.shape_cast %6 : vector<32x512xf32> to vector<4x8x512xf32>
    %c0_5 = arith.constant 0 : index
    %c0_6 = arith.constant 0 : index
    %c0_7 = arith.constant 0 : index
    %8 = vector.load %arg16[%c0_5, %c0_6, %c0_7] : memref<4x8x512xf32, #tpu.memory_space<vmem>>, vector<4x8x512xf32>
    tpu.vector_store %arg16[%c0_5, %c0_6, %c0_7], %7 {strides = array<i32>} : memref<4x8x512xf32, #tpu.memory_space<vmem>>, vector<4x8x512xf32>,
    %c0_8 = arith.constant 0 : index
    %c0_9 = arith.constant 0 : index
    %c0_10 = arith.constant 0 : index
    %9 = vector.load %arg14[%c0_8, %c0_9, %c0_10] : memref<2x8x128xf32, #tpu.memory_space<vmem>>, vector<1x8x128xf32>
    %10 = vector.shape_cast %9 : vector<1x8x128xf32> to vector<8x128xf32>
    %c0_11 = arith.constant 0 : index
    %c0_12 = arith.constant 0 : index
    %c0_13 = arith.constant 0 : index
    %11 = vector.load %arg15[%c0_11, %c0_12, %c0_13] : memref<2x8x128xf32, #tpu.memory_space<vmem>>, vector<1x8x128xf32>
    %12 = vector.shape_cast %11 : vector<1x8x128xf32> to vector<8x128xf32>
    %c0_i32_14 = arith.constant 0 : i32
    %13 = arith.index_cast %c0_i32_14 : i32 to index
    %c0_15 = arith.constant 0 : index
    %c0_16 = arith.constant 0 : index
    %14 = vector.load %arg16[%13, %c0_15, %c0_16] : memref<4x8x512xf32, #tpu.memory_space<vmem>>, vector<1x8x512xf32>
    %15 = vector.shape_cast %14 : vector<1x8x512xf32> to vector<8x512xf32>
    %16 = arith.truncf %10 : vector<8x128xf32> to vector<8x128xbf16>
    %c0_17 = arith.constant 0 : index
    %c0_18 = arith.constant 0 : index
    %c0_19 = arith.constant 0 : index
    %17 = vector.load %arg13[%c0_17, %c0_18, %c0_19] : memref<2x128x512xbf16, #tpu.memory_space<vmem>>, vector<1x128x512xbf16>
    %18 = vector.shape_cast %17 : vector<1x128x512xbf16> to vector<128x512xbf16>
    %cst_20 = arith.constant dense<0.000000e+00> : vector<8x512xf32>
    %19 = tpu.matmul %16, %18, %cst_20 {dimension_numbers = #tpu.dot_dimension_numbers<[1], [0], [0], [1], [0, 0, 1, 1], [], []>} : vector<8x128xbf16>, vector<128x512xbf16>, vector<8x512xf32> -> vector<8x512xf32>
    %20 = arith.addf %15, %19 : vector<8x512xf32>
    %21 = vector.extract_strided_slice %20 {offsets = [0, 0], sizes = [8, 128], strides = [1, 1]} : vector<8x512xf32> to vector<8x128xf32>
    %22 = arith.negf %21 : vector<8x128xf32>
    %23 = math.exp %22 : vector<8x128xf32>
    %cst_21 = arith.constant 1.000000e+00 : f32
    %24 = vector.broadcast %cst_21 : f32 to vector<8x128xf32>
    %25 = arith.addf %24, %23 : vector<8x128xf32>
    %26 = arith.divf %24, %25 : vector<8x128xf32>
    %27 = vector.extract_strided_slice %20 {offsets = [0, 128], sizes = [8, 128], strides = [1, 1]} : vector<8x512xf32> to vector<8x128xf32>
    %28 = arith.negf %27 : vector<8x128xf32>
    %29 = math.exp %28 : vector<8x128xf32>
    %cst_22 = arith.constant 1.000000e+00 : f32
    %30 = vector.broadcast %cst_22 : f32 to vector<8x128xf32>
    %31 = arith.addf %30, %29 : vector<8x128xf32>
    %32 = arith.divf %30, %31 : vector<8x128xf32>
    %33 = vector.extract_strided_slice %20 {offsets = [0, 256], sizes = [8, 128], strides = [1, 1]} : vector<8x512xf32> to vector<8x128xf32>
    %34 = math.tanh %33 : vector<8x128xf32>
    %35 = vector.extract_strided_slice %20 {offsets = [0, 384], sizes = [8, 128], strides = [1, 1]} : vector<8x512xf32> to vector<8x128xf32>
    %36 = arith.negf %35 : vector<8x128xf32>
    %37 = math.exp %36 : vector<8x128xf32>
    %cst_23 = arith.constant 1.000000e+00 : f32
    %38 = vector.broadcast %cst_23 : f32 to vector<8x128xf32>
    %39 = arith.addf %38, %37 : vector<8x128xf32>
    %40 = arith.divf %38, %39 : vector<8x128xf32>
    %41 = arith.mulf %32, %12 : vector<8x128xf32>
    %42 = arith.mulf %26, %34 : vector<8x128xf32>
    %43 = arith.addf %41, %42 : vector<8x128xf32>
    %44 = math.tanh %43 : vector<8x128xf32>
    %45 = arith.mulf %40, %44 : vector<8x128xf32>
    %46 = arith.truncf %45 : vector<8x128xf32> to vector<8x128xbf16>
    %47 = arith.index_cast %c0_i32_14 : i32 to index
    %c0_24 = arith.constant 0 : index
    %c0_25 = arith.constant 0 : index
    %48 = vector.load %arg8[%47, %c0_24, %c0_25] : memref<4x8x128xbf16, #tpu.memory_space<vmem>>, vector<1x8x128xbf16>
    %49 = vector.shape_cast %48 : vector<1x8x128xbf16> to vector<8x128xbf16>
    %50 = vector.shape_cast %46 : vector<8x128xbf16> to vector<1x8x128xbf16>
    tpu.vector_store %arg8[%47, %c0_24, %c0_25], %50 {strides = array<i32>} : memref<4x8x128xbf16, #tpu.memory_space<vmem>>, vector<1x8x128xbf16>,
    %c1_i32 = arith.constant 1 : i32
    %51 = arith.index_cast %c1_i32 : i32 to index
    %c0_26 = arith.constant 0 : index
    %c0_27 = arith.constant 0 : index
    %52 = vector.load %arg16[%51, %c0_26, %c0_27] : memref<4x8x512xf32, #tpu.memory_space<vmem>>, vector<1x8x512xf32>
    %53 = vector.shape_cast %52 : vector<1x8x512xf32> to vector<8x512xf32>
    %54 = arith.truncf %45 : vector<8x128xf32> to vector<8x128xbf16>
    %c0_28 = arith.constant 0 : index
    %c0_29 = arith.constant 0 : index
    %c0_30 = arith.constant 0 : index
    %55 = vector.load %arg13[%c0_28, %c0_29, %c0_30] : memref<2x128x512xbf16, #tpu.memory_space<vmem>>, vector<1x128x512xbf16>
    %56 = vector.shape_cast %55 : vector<1x128x512xbf16> to vector<128x512xbf16>
    %cst_31 = arith.constant dense<0.000000e+00> : vector<8x512xf32>
    %57 = tpu.matmul %54, %56, %cst_31 {dimension_numbers = #tpu.dot_dimension_numbers<[1], [0], [0], [1], [0, 0, 1, 1], [], []>} : vector<8x128xbf16>, vector<128x512xbf16>, vector<8x512xf32> -> vector<8x512xf32>
    %58 = arith.addf %53, %57 : vector<8x512xf32>
    %59 = vector.extract_strided_slice %58 {offsets = [0, 0], sizes = [8, 128], strides = [1, 1]} : vector<8x512xf32> to vector<8x128xf32>
    %60 = arith.negf %59 : vector<8x128xf32>
    %61 = math.exp %60 : vector<8x128xf32>
    %cst_32 = arith.constant 1.000000e+00 : f32
    %62 = vector.broadcast %cst_32 : f32 to vector<8x128xf32>
    %63 = arith.addf %62, %61 : vector<8x128xf32>
    %64 = arith.divf %62, %63 : vector<8x128xf32>
    %65 = vector.extract_strided_slice %58 {offsets = [0, 128], sizes = [8, 128], strides = [1, 1]} : vector<8x512xf32> to vector<8x128xf32>
    %66 = arith.negf %65 : vector<8x128xf32>
    %67 = math.exp %66 : vector<8x128xf32>
    %cst_33 = arith.constant 1.000000e+00 : f32
    %68 = vector.broadcast %cst_33 : f32 to vector<8x128xf32>
    %69 = arith.addf %68, %67 : vector<8x128xf32>
    %70 = arith.divf %68, %69 : vector<8x128xf32>
    %71 = vector.extract_strided_slice %58 {offsets = [0, 256], sizes = [8, 128], strides = [1, 1]} : vector<8x512xf32> to vector<8x128xf32>
    %72 = math.tanh %71 : vector<8x128xf32>
    %73 = vector.extract_strided_slice %58 {offsets = [0, 384], sizes = [8, 128], strides = [1, 1]} : vector<8x512xf32> to vector<8x128xf32>
    %74 = arith.negf %73 : vector<8x128xf32>
    %75 = math.exp %74 : vector<8x128xf32>
    %cst_34 = arith.constant 1.000000e+00 : f32
    %76 = vector.broadcast %cst_34 : f32 to vector<8x128xf32>
    %77 = arith.addf %76, %75 : vector<8x128xf32>
    %78 = arith.divf %76, %77 : vector<8x128xf32>
    %79 = arith.mulf %70, %43 : vector<8x128xf32>
    %80 = arith.mulf %64, %72 : vector<8x128xf32>
    %81 = arith.addf %79, %80 : vector<8x128xf32>
    %82 = math.tanh %81 : vector<8x128xf32>
    %83 = arith.mulf %78, %82 : vector<8x128xf32>
    %84 = arith.truncf %83 : vector<8x128xf32> to vector<8x128xbf16>
    %85 = arith.index_cast %c1_i32 : i32 to index
    %c0_35 = arith.constant 0 : index
    %c0_36 = arith.constant 0 : index
    %86 = vector.load %arg8[%85, %c0_35, %c0_36] : memref<4x8x128xbf16, #tpu.memory_space<vmem>>, vector<1x8x128xbf16>
    %87 = vector.shape_cast %86 : vector<1x8x128xbf16> to vector<8x128xbf16>
    %88 = vector.shape_cast %84 : vector<8x128xbf16> to vector<1x8x128xbf16>
    tpu.vector_store %arg8[%85, %c0_35, %c0_36], %88 {strides = array<i32>} : memref<4x8x128xbf16, #tpu.memory_space<vmem>>, vector<1x8x128xbf16>,
    %c2_i32 = arith.constant 2 : i32
    %89 = arith.index_cast %c2_i32 : i32 to index
    %c0_37 = arith.constant 0 : index
    %c0_38 = arith.constant 0 : index
    %90 = vector.load %arg16[%89, %c0_37, %c0_38] : memref<4x8x512xf32, #tpu.memory_space<vmem>>, vector<1x8x512xf32>
    %91 = vector.shape_cast %90 : vector<1x8x512xf32> to vector<8x512xf32>
    %92 = arith.truncf %83 : vector<8x128xf32> to vector<8x128xbf16>
    %c0_39 = arith.constant 0 : index
    %c0_40 = arith.constant 0 : index
    %c0_41 = arith.constant 0 : index
    %93 = vector.load %arg13[%c0_39, %c0_40, %c0_41] : memref<2x128x512xbf16, #tpu.memory_space<vmem>>, vector<1x128x512xbf16>
    %94 = vector.shape_cast %93 : vector<1x128x512xbf16> to vector<128x512xbf16>
    %cst_42 = arith.constant dense<0.000000e+00> : vector<8x512xf32>
    %95 = tpu.matmul %92, %94, %cst_42 {dimension_numbers = #tpu.dot_dimension_numbers<[1], [0], [0], [1], [0, 0, 1, 1], [], []>} : vector<8x128xbf16>, vector<128x512xbf16>, vector<8x512xf32> -> vector<8x512xf32>
    %96 = arith.addf %91, %95 : vector<8x512xf32>
    %97 = vector.extract_strided_slice %96 {offsets = [0, 0], sizes = [8, 128], strides = [1, 1]} : vector<8x512xf32> to vector<8x128xf32>
    %98 = arith.negf %97 : vector<8x128xf32>
    %99 = math.exp %98 : vector<8x128xf32>
    %cst_43 = arith.constant 1.000000e+00 : f32
    %100 = vector.broadcast %cst_43 : f32 to vector<8x128xf32>
    %101 = arith.addf %100, %99 : vector<8x128xf32>
    %102 = arith.divf %100, %101 : vector<8x128xf32>
    %103 = vector.extract_strided_slice %96 {offsets = [0, 128], sizes = [8, 128], strides = [1, 1]} : vector<8x512xf32> to vector<8x128xf32>
    %104 = arith.negf %103 : vector<8x128xf32>
    %105 = math.exp %104 : vector<8x128xf32>
    %cst_44 = arith.constant 1.000000e+00 : f32
    %106 = vector.broadcast %cst_44 : f32 to vector<8x128xf32>
    %107 = arith.addf %106, %105 : vector<8x128xf32>
    %108 = arith.divf %106, %107 : vector<8x128xf32>
    %109 = vector.extract_strided_slice %96 {offsets = [0, 256], sizes = [8, 128], strides = [1, 1]} : vector<8x512xf32> to vector<8x128xf32>
    %110 = math.tanh %109 : vector<8x128xf32>
    %111 = vector.extract_strided_slice %96 {offsets = [0, 384], sizes = [8, 128], strides = [1, 1]} : vector<8x512xf32> to vector<8x128xf32>
    %112 = arith.negf %111 : vector<8x128xf32>
    %113 = math.exp %112 : vector<8x128xf32>
    %cst_45 = arith.constant 1.000000e+00 : f32
    %114 = vector.broadcast %cst_45 : f32 to vector<8x128xf32>
    %115 = arith.addf %114, %113 : vector<8x128xf32>
    %116 = arith.divf %114, %115 : vector<8x128xf32>
    %117 = arith.mulf %108, %81 : vector<8x128xf32>
    %118 = arith.mulf %102, %110 : vector<8x128xf32>
    %119 = arith.addf %117, %118 : vector<8x128xf32>
    %120 = math.tanh %119 : vector<8x128xf32>
    %121 = arith.mulf %116, %120 : vector<8x128xf32>
    %122 = arith.truncf %121 : vector<8x128xf32> to vector<8x128xbf16>
    %123 = arith.index_cast %c2_i32 : i32 to index
    %c0_46 = arith.constant 0 : index
    %c0_47 = arith.constant 0 : index
    %124 = vector.load %arg8[%123, %c0_46, %c0_47] : memref<4x8x128xbf16, #tpu.memory_space<vmem>>, vector<1x8x128xbf16>
    %125 = vector.shape_cast %124 : vector<1x8x128xbf16> to vector<8x128xbf16>
    %126 = vector.shape_cast %122 : vector<8x128xbf16> to vector<1x8x128xbf16>
    tpu.vector_store %arg8[%123, %c0_46, %c0_47], %126 {strides = array<i32>} : memref<4x8x128xbf16, #tpu.memory_space<vmem>>, vector<1x8x128xbf16>,
    %c3_i32 = arith.constant 3 : i32
    %127 = arith.index_cast %c3_i32 : i32 to index
    %c0_48 = arith.constant 0 : index
    %c0_49 = arith.constant 0 : index
    %128 = vector.load %arg16[%127, %c0_48, %c0_49] : memref<4x8x512xf32, #tpu.memory_space<vmem>>, vector<1x8x512xf32>
    %129 = vector.shape_cast %128 : vector<1x8x512xf32> to vector<8x512xf32>
    %130 = arith.truncf %121 : vector<8x128xf32> to vector<8x128xbf16>
    %c0_50 = arith.constant 0 : index
    %c0_51 = arith.constant 0 : index
    %c0_52 = arith.constant 0 : index
    %131 = vector.load %arg13[%c0_50, %c0_51, %c0_52] : memref<2x128x512xbf16, #tpu.memory_space<vmem>>, vector<1x128x512xbf16>
    %132 = vector.shape_cast %131 : vector<1x128x512xbf16> to vector<128x512xbf16>
    %cst_53 = arith.constant dense<0.000000e+00> : vector<8x512xf32>
    %133 = tpu.matmul %130, %132, %cst_53 {dimension_numbers = #tpu.dot_dimension_numbers<[1], [0], [0], [1], [0, 0, 1, 1], [], []>} : vector<8x128xbf16>, vector<128x512xbf16>, vector<8x512xf32> -> vector<8x512xf32>
    %134 = arith.addf %129, %133 : vector<8x512xf32>
    %135 = vector.extract_strided_slice %134 {offsets = [0, 0], sizes = [8, 128], strides = [1, 1]} : vector<8x512xf32> to vector<8x128xf32>
    %136 = arith.negf %135 : vector<8x128xf32>
    %137 = math.exp %136 : vector<8x128xf32>
    %cst_54 = arith.constant 1.000000e+00 : f32
    %138 = vector.broadcast %cst_54 : f32 to vector<8x128xf32>
    %139 = arith.addf %138, %137 : vector<8x128xf32>
    %140 = arith.divf %138, %139 : vector<8x128xf32>
    %141 = vector.extract_strided_slice %134 {offsets = [0, 128], sizes = [8, 128], strides = [1, 1]} : vector<8x512xf32> to vector<8x128xf32>
    %142 = arith.negf %141 : vector<8x128xf32>
    %143 = math.exp %142 : vector<8x128xf32>
    %cst_55 = arith.constant 1.000000e+00 : f32
    %144 = vector.broadcast %cst_55 : f32 to vector<8x128xf32>
    %145 = arith.addf %144, %143 : vector<8x128xf32>
    %146 = arith.divf %144, %145 : vector<8x128xf32>
    %147 = vector.extract_strided_slice %134 {offsets = [0, 256], sizes = [8, 128], strides = [1, 1]} : vector<8x512xf32> to vector<8x128xf32>
    %148 = math.tanh %147 : vector<8x128xf32>
    %149 = vector.extract_strided_slice %134 {offsets = [0, 384], sizes = [8, 128], strides = [1, 1]} : vector<8x512xf32> to vector<8x128xf32>
    %150 = arith.negf %149 : vector<8x128xf32>
    %151 = math.exp %150 : vector<8x128xf32>
    %cst_56 = arith.constant 1.000000e+00 : f32
    %152 = vector.broadcast %cst_56 : f32 to vector<8x128xf32>
    %153 = arith.addf %152, %151 : vector<8x128xf32>
    %154 = arith.divf %152, %153 : vector<8x128xf32>
    %155 = arith.mulf %146, %119 : vector<8x128xf32>
    %156 = arith.mulf %140, %148 : vector<8x128xf32>
    %157 = arith.addf %155, %156 : vector<8x128xf32>
    %158 = math.tanh %157 : vector<8x128xf32>
    %159 = arith.mulf %154, %158 : vector<8x128xf32>
    %160 = arith.truncf %159 : vector<8x128xf32> to vector<8x128xbf16>
    %161 = arith.index_cast %c3_i32 : i32 to index
    %c0_57 = arith.constant 0 : index
    %c0_58 = arith.constant 0 : index
    %162 = vector.load %arg8[%161, %c0_57, %c0_58] : memref<4x8x128xbf16, #tpu.memory_space<vmem>>, vector<1x8x128xbf16>
    %163 = vector.shape_cast %162 : vector<1x8x128xbf16> to vector<8x128xbf16>
    %164 = vector.shape_cast %160 : vector<8x128xbf16> to vector<1x8x128xbf16>
    tpu.vector_store %arg8[%161, %c0_57, %c0_58], %164 {strides = array<i32>} : memref<4x8x128xbf16, #tpu.memory_space<vmem>>, vector<1x8x128xbf16>,
    %c4_i32 = arith.constant 4 : i32
    %c0_59 = arith.constant 0 : index
    %c0_60 = arith.constant 0 : index
    %c0_61 = arith.constant 0 : index
    %165 = vector.load %arg14[%c0_59, %c0_60, %c0_61] : memref<2x8x128xf32, #tpu.memory_space<vmem>>, vector<1x8x128xf32>
    %166 = vector.shape_cast %165 : vector<1x8x128xf32> to vector<8x128xf32>
    %167 = vector.shape_cast %159 : vector<8x128xf32> to vector<1x8x128xf32>
    tpu.vector_store %arg14[%c0_59, %c0_60, %c0_61], %167 {strides = array<i32>} : memref<2x8x128xf32, #tpu.memory_space<vmem>>, vector<1x8x128xf32>,
    %c0_62 = arith.constant 0 : index
    %c0_63 = arith.constant 0 : index
    %c0_64 = arith.constant 0 : index
    %168 = vector.load %arg15[%c0_62, %c0_63, %c0_64] : memref<2x8x128xf32, #tpu.memory_space<vmem>>, vector<1x8x128xf32>
    %169 = vector.shape_cast %168 : vector<1x8x128xf32> to vector<8x128xf32>
    %170 = vector.shape_cast %157 : vector<8x128xf32> to vector<1x8x128xf32>
    tpu.vector_store %arg15[%c0_62, %c0_63, %c0_64], %170 {strides = array<i32>} : memref<2x8x128xf32, #tpu.memory_space<vmem>>, vector<1x8x128xf32>,
    %c0_65 = arith.constant 0 : index
    %c0_66 = arith.constant 0 : index
    %c0_67 = arith.constant 0 : index
    %171 = vector.load %arg8[%c0_65, %c0_66, %c0_67] : memref<4x8x128xbf16, #tpu.memory_space<vmem>>, vector<4x8x128xbf16>
    %172 = vector.shape_cast %171 : vector<4x8x128xbf16> to vector<32x128xbf16>
    %c0_68 = arith.constant 0 : index
    %c0_69 = arith.constant 0 : index
    %c0_70 = arith.constant 0 : index
    %173 = vector.load %arg12[%c0_68, %c0_69, %c0_70] : memref<1x128x512xbf16, #tpu.memory_space<vmem>>, vector<1x128x512xbf16>
    %174 = vector.shape_cast %173 : vector<1x128x512xbf16> to vector<128x512xbf16>
    %cst_71 = arith.constant dense<0.000000e+00> : vector<32x512xf32>
    %175 = tpu.matmul %172, %174, %cst_71 {dimension_numbers = #tpu.dot_dimension_numbers<[1], [0], [0], [1], [0, 0, 1, 1], [], []>} : vector<32x128xbf16>, vector<128x512xbf16>, vector<32x512xf32> -> vector<32x512xf32>
    %176 = vector.shape_cast %175 : vector<32x512xf32> to vector<4x8x512xf32>
    %c0_72 = arith.constant 0 : index
    %c0_73 = arith.constant 0 : index
    %c0_74 = arith.constant 0 : index
    %177 = vector.load %arg16[%c0_72, %c0_73, %c0_74] : memref<4x8x512xf32, #tpu.memory_space<vmem>>, vector<4x8x512xf32>
    tpu.vector_store %arg16[%c0_72, %c0_73, %c0_74], %176 {strides = array<i32>} : memref<4x8x512xf32, #tpu.memory_space<vmem>>, vector<4x8x512xf32>,
    %c1 = arith.constant 1 : index
    %c0_75 = arith.constant 0 : index
    %c0_76 = arith.constant 0 : index
    %178 = vector.load %arg14[%c1, %c0_75, %c0_76] : memref<2x8x128xf32, #tpu.memory_space<vmem>>, vector<1x8x128xf32>
    %179 = vector.shape_cast %178 : vector<1x8x128xf32> to vector<8x128xf32>
    %c1_77 = arith.constant 1 : index
    %c0_78 = arith.constant 0 : index
    %c0_79 = arith.constant 0 : index
    %180 = vector.load %arg15[%c1_77, %c0_78, %c0_79] : memref<2x8x128xf32, #tpu.memory_space<vmem>>, vector<1x8x128xf32>
    %181 = vector.shape_cast %180 : vector<1x8x128xf32> to vector<8x128xf32>
    %c0_i32_80 = arith.constant 0 : i32
    %182 = arith.index_cast %c0_i32_80 : i32 to index
    %c0_81 = arith.constant 0 : index
    %c0_82 = arith.constant 0 : index
    %183 = vector.load %arg16[%182, %c0_81, %c0_82] : memref<4x8x512xf32, #tpu.memory_space<vmem>>, vector<1x8x512xf32>
    %184 = vector.shape_cast %183 : vector<1x8x512xf32> to vector<8x512xf32>
    %185 = arith.truncf %179 : vector<8x128xf32> to vector<8x128xbf16>
    %c1_83 = arith.constant 1 : index
    %c0_84 = arith.constant 0 : index
    %c0_85 = arith.constant 0 : index
    %186 = vector.load %arg13[%c1_83, %c0_84, %c0_85] : memref<2x128x512xbf16, #tpu.memory_space<vmem>>, vector<1x128x512xbf16>
    %187 = vector.shape_cast %186 : vector<1x128x512xbf16> to vector<128x512xbf16>
    %cst_86 = arith.constant dense<0.000000e+00> : vector<8x512xf32>
    %188 = tpu.matmul %185, %187, %cst_86 {dimension_numbers = #tpu.dot_dimension_numbers<[1], [0], [0], [1], [0, 0, 1, 1], [], []>} : vector<8x128xbf16>, vector<128x512xbf16>, vector<8x512xf32> -> vector<8x512xf32>
    %189 = arith.addf %184, %188 : vector<8x512xf32>
    %190 = vector.extract_strided_slice %189 {offsets = [0, 0], sizes = [8, 128], strides = [1, 1]} : vector<8x512xf32> to vector<8x128xf32>
    %191 = arith.negf %190 : vector<8x128xf32>
    %192 = math.exp %191 : vector<8x128xf32>
    %cst_87 = arith.constant 1.000000e+00 : f32
    %193 = vector.broadcast %cst_87 : f32 to vector<8x128xf32>
    %194 = arith.addf %193, %192 : vector<8x128xf32>
    %195 = arith.divf %193, %194 : vector<8x128xf32>
    %196 = vector.extract_strided_slice %189 {offsets = [0, 128], sizes = [8, 128], strides = [1, 1]} : vector<8x512xf32> to vector<8x128xf32>
    %197 = arith.negf %196 : vector<8x128xf32>
    %198 = math.exp %197 : vector<8x128xf32>
    %cst_88 = arith.constant 1.000000e+00 : f32
    %199 = vector.broadcast %cst_88 : f32 to vector<8x128xf32>
    %200 = arith.addf %199, %198 : vector<8x128xf32>
    %201 = arith.divf %199, %200 : vector<8x128xf32>
    %202 = vector.extract_strided_slice %189 {offsets = [0, 256], sizes = [8, 128], strides = [1, 1]} : vector<8x512xf32> to vector<8x128xf32>
    %203 = math.tanh %202 : vector<8x128xf32>
    %204 = vector.extract_strided_slice %189 {offsets = [0, 384], sizes = [8, 128], strides = [1, 1]} : vector<8x512xf32> to vector<8x128xf32>
    %205 = arith.negf %204 : vector<8x128xf32>
    %206 = math.exp %205 : vector<8x128xf32>
    %cst_89 = arith.constant 1.000000e+00 : f32
    %207 = vector.broadcast %cst_89 : f32 to vector<8x128xf32>
    %208 = arith.addf %207, %206 : vector<8x128xf32>
    %209 = arith.divf %207, %208 : vector<8x128xf32>
    %210 = arith.mulf %201, %181 : vector<8x128xf32>
    %211 = arith.mulf %195, %203 : vector<8x128xf32>
    %212 = arith.addf %210, %211 : vector<8x128xf32>
    %213 = math.tanh %212 : vector<8x128xf32>
    %214 = arith.mulf %209, %213 : vector<8x128xf32>
    %215 = arith.truncf %214 : vector<8x128xf32> to vector<8x128xbf16>
    %216 = arith.index_cast %c0_i32_80 : i32 to index
    %c0_90 = arith.constant 0 : index
    %c0_91 = arith.constant 0 : index
    %217 = vector.load %arg8[%216, %c0_90, %c0_91] : memref<4x8x128xbf16, #tpu.memory_space<vmem>>, vector<1x8x128xbf16>
    %218 = vector.shape_cast %217 : vector<1x8x128xbf16> to vector<8x128xbf16>
    %219 = vector.shape_cast %215 : vector<8x128xbf16> to vector<1x8x128xbf16>
    tpu.vector_store %arg8[%216, %c0_90, %c0_91], %219 {strides = array<i32>} : memref<4x8x128xbf16, #tpu.memory_space<vmem>>, vector<1x8x128xbf16>,
    %c1_i32_92 = arith.constant 1 : i32
    %220 = arith.index_cast %c1_i32_92 : i32 to index
    %c0_93 = arith.constant 0 : index
    %c0_94 = arith.constant 0 : index
    %221 = vector.load %arg16[%220, %c0_93, %c0_94] : memref<4x8x512xf32, #tpu.memory_space<vmem>>, vector<1x8x512xf32>
    %222 = vector.shape_cast %221 : vector<1x8x512xf32> to vector<8x512xf32>
    %223 = arith.truncf %214 : vector<8x128xf32> to vector<8x128xbf16>
    %c1_95 = arith.constant 1 : index
    %c0_96 = arith.constant 0 : index
    %c0_97 = arith.constant 0 : index
    %224 = vector.load %arg13[%c1_95, %c0_96, %c0_97] : memref<2x128x512xbf16, #tpu.memory_space<vmem>>, vector<1x128x512xbf16>
    %225 = vector.shape_cast %224 : vector<1x128x512xbf16> to vector<128x512xbf16>
    %cst_98 = arith.constant dense<0.000000e+00> : vector<8x512xf32>
    %226 = tpu.matmul %223, %225, %cst_98 {dimension_numbers = #tpu.dot_dimension_numbers<[1], [0], [0], [1], [0, 0, 1, 1], [], []>} : vector<8x128xbf16>, vector<128x512xbf16>, vector<8x512xf32> -> vector<8x512xf32>
    %227 = arith.addf %222, %226 : vector<8x512xf32>
    %228 = vector.extract_strided_slice %227 {offsets = [0, 0], sizes = [8, 128], strides = [1, 1]} : vector<8x512xf32> to vector<8x128xf32>
    %229 = arith.negf %228 : vector<8x128xf32>
    %230 = math.exp %229 : vector<8x128xf32>
    %cst_99 = arith.constant 1.000000e+00 : f32
    %231 = vector.broadcast %cst_99 : f32 to vector<8x128xf32>
    %232 = arith.addf %231, %230 : vector<8x128xf32>
    %233 = arith.divf %231, %232 : vector<8x128xf32>
    %234 = vector.extract_strided_slice %227 {offsets = [0, 128], sizes = [8, 128], strides = [1, 1]} : vector<8x512xf32> to vector<8x128xf32>
    %235 = arith.negf %234 : vector<8x128xf32>
    %236 = math.exp %235 : vector<8x128xf32>
    %cst_100 = arith.constant 1.000000e+00 : f32
    %237 = vector.broadcast %cst_100 : f32 to vector<8x128xf32>
    %238 = arith.addf %237, %236 : vector<8x128xf32>
    %239 = arith.divf %237, %238 : vector<8x128xf32>
    %240 = vector.extract_strided_slice %227 {offsets = [0, 256], sizes = [8, 128], strides = [1, 1]} : vector<8x512xf32> to vector<8x128xf32>
    %241 = math.tanh %240 : vector<8x128xf32>
    %242 = vector.extract_strided_slice %227 {offsets = [0, 384], sizes = [8, 128], strides = [1, 1]} : vector<8x512xf32> to vector<8x128xf32>
    %243 = arith.negf %242 : vector<8x128xf32>
    %244 = math.exp %243 : vector<8x128xf32>
    %cst_101 = arith.constant 1.000000e+00 : f32
    %245 = vector.broadcast %cst_101 : f32 to vector<8x128xf32>
    %246 = arith.addf %245, %244 : vector<8x128xf32>
    %247 = arith.divf %245, %246 : vector<8x128xf32>
    %248 = arith.mulf %239, %212 : vector<8x128xf32>
    %249 = arith.mulf %233, %241 : vector<8x128xf32>
    %250 = arith.addf %248, %249 : vector<8x128xf32>
    %251 = math.tanh %250 : vector<8x128xf32>
    %252 = arith.mulf %247, %251 : vector<8x128xf32>
    %253 = arith.truncf %252 : vector<8x128xf32> to vector<8x128xbf16>
    %254 = arith.index_cast %c1_i32_92 : i32 to index
    %c0_102 = arith.constant 0 : index
    %c0_103 = arith.constant 0 : index
    %255 = vector.load %arg8[%254, %c0_102, %c0_103] : memref<4x8x128xbf16, #tpu.memory_space<vmem>>, vector<1x8x128xbf16>
    %256 = vector.shape_cast %255 : vector<1x8x128xbf16> to vector<8x128xbf16>
    %257 = vector.shape_cast %253 : vector<8x128xbf16> to vector<1x8x128xbf16>
    tpu.vector_store %arg8[%254, %c0_102, %c0_103], %257 {strides = array<i32>} : memref<4x8x128xbf16, #tpu.memory_space<vmem>>, vector<1x8x128xbf16>,
    %c2_i32_104 = arith.constant 2 : i32
    %258 = arith.index_cast %c2_i32_104 : i32 to index
    %c0_105 = arith.constant 0 : index
    %c0_106 = arith.constant 0 : index
    %259 = vector.load %arg16[%258, %c0_105, %c0_106] : memref<4x8x512xf32, #tpu.memory_space<vmem>>, vector<1x8x512xf32>
    %260 = vector.shape_cast %259 : vector<1x8x512xf32> to vector<8x512xf32>
    %261 = arith.truncf %252 : vector<8x128xf32> to vector<8x128xbf16>
    %c1_107 = arith.constant 1 : index
    %c0_108 = arith.constant 0 : index
    %c0_109 = arith.constant 0 : index
    %262 = vector.load %arg13[%c1_107, %c0_108, %c0_109] : memref<2x128x512xbf16, #tpu.memory_space<vmem>>, vector<1x128x512xbf16>
    %263 = vector.shape_cast %262 : vector<1x128x512xbf16> to vector<128x512xbf16>
    %cst_110 = arith.constant dense<0.000000e+00> : vector<8x512xf32>
    %264 = tpu.matmul %261, %263, %cst_110 {dimension_numbers = #tpu.dot_dimension_numbers<[1], [0], [0], [1], [0, 0, 1, 1], [], []>} : vector<8x128xbf16>, vector<128x512xbf16>, vector<8x512xf32> -> vector<8x512xf32>
    %265 = arith.addf %260, %264 : vector<8x512xf32>
    %266 = vector.extract_strided_slice %265 {offsets = [0, 0], sizes = [8, 128], strides = [1, 1]} : vector<8x512xf32> to vector<8x128xf32>
    %267 = arith.negf %266 : vector<8x128xf32>
    %268 = math.exp %267 : vector<8x128xf32>
    %cst_111 = arith.constant 1.000000e+00 : f32
    %269 = vector.broadcast %cst_111 : f32 to vector<8x128xf32>
    %270 = arith.addf %269, %268 : vector<8x128xf32>
    %271 = arith.divf %269, %270 : vector<8x128xf32>
    %272 = vector.extract_strided_slice %265 {offsets = [0, 128], sizes = [8, 128], strides = [1, 1]} : vector<8x512xf32> to vector<8x128xf32>
    %273 = arith.negf %272 : vector<8x128xf32>
    %274 = math.exp %273 : vector<8x128xf32>
    %cst_112 = arith.constant 1.000000e+00 : f32
    %275 = vector.broadcast %cst_112 : f32 to vector<8x128xf32>
    %276 = arith.addf %275, %274 : vector<8x128xf32>
    %277 = arith.divf %275, %276 : vector<8x128xf32>
    %278 = vector.extract_strided_slice %265 {offsets = [0, 256], sizes = [8, 128], strides = [1, 1]} : vector<8x512xf32> to vector<8x128xf32>
    %279 = math.tanh %278 : vector<8x128xf32>
    %280 = vector.extract_strided_slice %265 {offsets = [0, 384], sizes = [8, 128], strides = [1, 1]} : vector<8x512xf32> to vector<8x128xf32>
    %281 = arith.negf %280 : vector<8x128xf32>
    %282 = math.exp %281 : vector<8x128xf32>
    %cst_113 = arith.constant 1.000000e+00 : f32
    %283 = vector.broadcast %cst_113 : f32 to vector<8x128xf32>
    %284 = arith.addf %283, %282 : vector<8x128xf32>
    %285 = arith.divf %283, %284 : vector<8x128xf32>
    %286 = arith.mulf %277, %250 : vector<8x128xf32>
    %287 = arith.mulf %271, %279 : vector<8x128xf32>
    %288 = arith.addf %286, %287 : vector<8x128xf32>
    %289 = math.tanh %288 : vector<8x128xf32>
    %290 = arith.mulf %285, %289 : vector<8x128xf32>
    %291 = arith.truncf %290 : vector<8x128xf32> to vector<8x128xbf16>
    %292 = arith.index_cast %c2_i32_104 : i32 to index
    %c0_114 = arith.constant 0 : index
    %c0_115 = arith.constant 0 : index
    %293 = vector.load %arg8[%292, %c0_114, %c0_115] : memref<4x8x128xbf16, #tpu.memory_space<vmem>>, vector<1x8x128xbf16>
    %294 = vector.shape_cast %293 : vector<1x8x128xbf16> to vector<8x128xbf16>
    %295 = vector.shape_cast %291 : vector<8x128xbf16> to vector<1x8x128xbf16>
    tpu.vector_store %arg8[%292, %c0_114, %c0_115], %295 {strides = array<i32>} : memref<4x8x128xbf16, #tpu.memory_space<vmem>>, vector<1x8x128xbf16>,
    %c3_i32_116 = arith.constant 3 : i32
    %296 = arith.index_cast %c3_i32_116 : i32 to index
    %c0_117 = arith.constant 0 : index
    %c0_118 = arith.constant 0 : index
    %297 = vector.load %arg16[%296, %c0_117, %c0_118] : memref<4x8x512xf32, #tpu.memory_space<vmem>>, vector<1x8x512xf32>
    %298 = vector.shape_cast %297 : vector<1x8x512xf32> to vector<8x512xf32>
    %299 = arith.truncf %290 : vector<8x128xf32> to vector<8x128xbf16>
    %c1_119 = arith.constant 1 : index
    %c0_120 = arith.constant 0 : index
    %c0_121 = arith.constant 0 : index
    %300 = vector.load %arg13[%c1_119, %c0_120, %c0_121] : memref<2x128x512xbf16, #tpu.memory_space<vmem>>, vector<1x128x512xbf16>
    %301 = vector.shape_cast %300 : vector<1x128x512xbf16> to vector<128x512xbf16>
    %cst_122 = arith.constant dense<0.000000e+00> : vector<8x512xf32>
    %302 = tpu.matmul %299, %301, %cst_122 {dimension_numbers = #tpu.dot_dimension_numbers<[1], [0], [0], [1], [0, 0, 1, 1], [], []>} : vector<8x128xbf16>, vector<128x512xbf16>, vector<8x512xf32> -> vector<8x512xf32>
    %303 = arith.addf %298, %302 : vector<8x512xf32>
    %304 = vector.extract_strided_slice %303 {offsets = [0, 0], sizes = [8, 128], strides = [1, 1]} : vector<8x512xf32> to vector<8x128xf32>
    %305 = arith.negf %304 : vector<8x128xf32>
    %306 = math.exp %305 : vector<8x128xf32>
    %cst_123 = arith.constant 1.000000e+00 : f32
    %307 = vector.broadcast %cst_123 : f32 to vector<8x128xf32>
    %308 = arith.addf %307, %306 : vector<8x128xf32>
    %309 = arith.divf %307, %308 : vector<8x128xf32>
    %310 = vector.extract_strided_slice %303 {offsets = [0, 128], sizes = [8, 128], strides = [1, 1]} : vector<8x512xf32> to vector<8x128xf32>
    %311 = arith.negf %310 : vector<8x128xf32>
    %312 = math.exp %311 : vector<8x128xf32>
    %cst_124 = arith.constant 1.000000e+00 : f32
    %313 = vector.broadcast %cst_124 : f32 to vector<8x128xf32>
    %314 = arith.addf %313, %312 : vector<8x128xf32>
    %315 = arith.divf %313, %314 : vector<8x128xf32>
    %316 = vector.extract_strided_slice %303 {offsets = [0, 256], sizes = [8, 128], strides = [1, 1]} : vector<8x512xf32> to vector<8x128xf32>
    %317 = math.tanh %316 : vector<8x128xf32>
    %318 = vector.extract_strided_slice %303 {offsets = [0, 384], sizes = [8, 128], strides = [1, 1]} : vector<8x512xf32> to vector<8x128xf32>
    %319 = arith.negf %318 : vector<8x128xf32>
    %320 = math.exp %319 : vector<8x128xf32>
    %cst_125 = arith.constant 1.000000e+00 : f32
    %321 = vector.broadcast %cst_125 : f32 to vector<8x128xf32>
    %322 = arith.addf %321, %320 : vector<8x128xf32>
    %323 = arith.divf %321, %322 : vector<8x128xf32>
    %324 = arith.mulf %315, %288 : vector<8x128xf32>
    %325 = arith.mulf %309, %317 : vector<8x128xf32>
    %326 = arith.addf %324, %325 : vector<8x128xf32>
    %327 = math.tanh %326 : vector<8x128xf32>
    %328 = arith.mulf %323, %327 : vector<8x128xf32>
    %329 = arith.truncf %328 : vector<8x128xf32> to vector<8x128xbf16>
    %330 = arith.index_cast %c3_i32_116 : i32 to index
    %c0_126 = arith.constant 0 : index
    %c0_127 = arith.constant 0 : index
    %331 = vector.load %arg8[%330, %c0_126, %c0_127] : memref<4x8x128xbf16, #tpu.memory_space<vmem>>, vector<1x8x128xbf16>
    %332 = vector.shape_cast %331 : vector<1x8x128xbf16> to vector<8x128xbf16>
    %333 = vector.shape_cast %329 : vector<8x128xbf16> to vector<1x8x128xbf16>
    tpu.vector_store %arg8[%330, %c0_126, %c0_127], %333 {strides = array<i32>} : memref<4x8x128xbf16, #tpu.memory_space<vmem>>, vector<1x8x128xbf16>,
    %c4_i32_128 = arith.constant 4 : i32
    %c1_129 = arith.constant 1 : index
    %c0_130 = arith.constant 0 : index
    %c0_131 = arith.constant 0 : index
    %334 = vector.load %arg14[%c1_129, %c0_130, %c0_131] : memref<2x8x128xf32, #tpu.memory_space<vmem>>, vector<1x8x128xf32>
    %335 = vector.shape_cast %334 : vector<1x8x128xf32> to vector<8x128xf32>
    %336 = vector.shape_cast %328 : vector<8x128xf32> to vector<1x8x128xf32>
    tpu.vector_store %arg14[%c1_129, %c0_130, %c0_131], %336 {strides = array<i32>} : memref<2x8x128xf32, #tpu.memory_space<vmem>>, vector<1x8x128xf32>,
    %c1_132 = arith.constant 1 : index
    %c0_133 = arith.constant 0 : index
    %c0_134 = arith.constant 0 : index
    %337 = vector.load %arg15[%c1_132, %c0_133, %c0_134] : memref<2x8x128xf32, #tpu.memory_space<vmem>>, vector<1x8x128xf32>
    %338 = vector.shape_cast %337 : vector<1x8x128xf32> to vector<8x128xf32>
    %339 = vector.shape_cast %326 : vector<8x128xf32> to vector<1x8x128xf32>
    tpu.vector_store %arg15[%c1_132, %c0_133, %c0_134], %339 {strides = array<i32>} : memref<2x8x128xf32, #tpu.memory_space<vmem>>, vector<1x8x128xf32>,
    %c1_i32_135 = arith.constant 1 : i32
    %340 = arith.cmpi eq, %arg1, %c1_i32_135 : i32
    %341 = arith.extui %340 : i1 to i32
    %c0_i32_136 = arith.constant 0 : i32
    %342 = arith.cmpi ne, %341, %c0_i32_136 : i32
    scf.if %342 {
      %c0_137 = arith.constant 0 : index
      %c0_138 = arith.constant 0 : index
      %c0_139 = arith.constant 0 : index
      %343 = vector.load %arg14[%c0_137, %c0_138, %c0_139] : memref<2x8x128xf32, #tpu.memory_space<vmem>>, vector<2x8x128xf32>
      %c0_140 = arith.constant 0 : index
      %c0_141 = arith.constant 0 : index
      %c0_142 = arith.constant 0 : index
      %344 = vector.load %arg9[%c0_140, %c0_141, %c0_142] : memref<2x8x128xf32, #tpu.memory_space<vmem>>, vector<2x8x128xf32>
      tpu.vector_store %arg9[%c0_140, %c0_141, %c0_142], %343 {strides = array<i32>} : memref<2x8x128xf32, #tpu.memory_space<vmem>>, vector<2x8x128xf32>,
      %c0_143 = arith.constant 0 : index
      %c0_144 = arith.constant 0 : index
      %c0_145 = arith.constant 0 : index
      %345 = vector.load %arg15[%c0_143, %c0_144, %c0_145] : memref<2x8x128xf32, #tpu.memory_space<vmem>>, vector<2x8x128xf32>
      %c0_146 = arith.constant 0 : index
      %c0_147 = arith.constant 0 : index
      %c0_148 = arith.constant 0 : index
      %346 = vector.load %arg10[%c0_146, %c0_147, %c0_148] : memref<2x8x128xf32, #tpu.memory_space<vmem>>, vector<2x8x128xf32>
      tpu.vector_store %arg10[%c0_146, %c0_147, %c0_148], %345 {strides = array<i32>} : memref<2x8x128xf32, #tpu.memory_space<vmem>>, vector<2x8x128xf32>,
    } else {
    }
    return
  }
  func.func @transform_0(%arg0: i32, %arg1: i32) -> (i32, i32, i32) {
    %c0_i32 = arith.constant 0 : i32
    %c0_i32_0 = arith.constant 0 : i32
    return %arg1, %arg0, %c0_i32 : i32, i32, i32
  }
  func.func @transform_4(%arg0: i32, %arg1: i32) -> (i32, i32, i32) {
    %c0_i32 = arith.constant 0 : i32
    %c0_i32_0 = arith.constant 0 : i32
    %c0_i32_1 = arith.constant 0 : i32
    return %c0_i32, %arg0, %c0_i32_0 : i32, i32, i32
  }
  func.func @transform_5(%arg0: i32, %arg1: i32) -> (i32, i32, i32) {
    %c0_i32 = arith.constant 0 : i32
    %c0_i32_0 = arith.constant 0 : i32
    %c0_i32_1 = arith.constant 0 : i32
    return %c0_i32, %arg0, %c0_i32_0 : i32, i32, i32
  }
  func.func @transform_6(%arg0: i32, %arg1: i32) -> (i32, i32, i32) {
    %c0_i32 = arith.constant 0 : i32
    %c0_i32_0 = arith.constant 0 : i32
    return %arg1, %arg0, %c0_i32 : i32, i32, i32
  }
  func.func @transform_7(%arg0: i32, %arg1: i32) -> (i32, i32, i32) {
    %c0_i32 = arith.constant 0 : i32
    %c0_i32_0 = arith.constant 0 : i32
    %c0_i32_1 = arith.constant 0 : i32
    return %c0_i32, %arg0, %c0_i32_0 : i32, i32, i32
  }
  func.func @transform_8(%arg0: i32, %arg1: i32) -> (i32, i32, i32) {
    %c0_i32 = arith.constant 0 : i32
    %c0_i32_0 = arith.constant 0 : i32
    %c0_i32_1 = arith.constant 0 : i32
    return %c0_i32, %arg0, %c0_i32_0 : i32, i32, i32
  }
}

</mosaic_0001>

<bundles_post_ra>
// kernel: rnnlm_forward.3
= control target key start
LH: loop header
LB: loop body
LE: loop exit
PB: predicated region body
PF: predicated region fallthrough
CT: control target
= control target key end

     0   :  { %s410_s1 = inlined_call_operand.vmem [shape: bf16[128,128], index: 1, kind: input, shape index: {}]   ;;  %s411_s0 = inlined_call_operand.vmem [shape: bf16[64,128], index: 0, kind: input, shape index: {}]   ;;  %s412_s2 = inlined_call_operand.vmem [shape: f32[1,128], index: 2, kind: input, shape index: {}]   ;;  %s413_s3 = inlined_call_operand.vmem [shape: f32[64,128], index: 3, kind: output, shape index: {}]  }
   0x1   :  { %v315_v0 = vld [vmem:[%s410_s1] sm:$0xff]   ;;  %v316_v1 = vld [vmem:[%s410_s1 + $0x8] sm:$0xff]   ;;  %v317_v2 = vld [vmem:[%s410_s1 + $0x10] sm:$0xff]  }
   0x2   :  { %275 = vmatprep.subr.bf16.mxu0 %v315_v0  ;;  %299 = vmatprep.subr.bf16.mxu1 %v315_v0  ;;  %v318_v3 = vld [vmem:[%s410_s1 + $0x18] sm:$0xff]   ;;  %v323_v4 = vld [vmem:[%s411_s0] sm:$0xff]   ;;  %v324_v5 = vld [vmem:[%s411_s0 + $0x10] sm:$0xff]  }
   0x3   :  { %276 = vmatpush3.bf16.msra.mxu0 %v315_v0  ;;  %307 = vmatpush3.bf16.msra.mxu1 %v315_v0  ;;  %v319_v6 = vld [vmem:[%s410_s1 + $0x20] sm:$0xff]   ;;  %v320_v7 = vld [vmem:[%s410_s1 + $0x28] sm:$0xff]   ;;  %v321_v8 = vld [vmem:[%s410_s1 + $0x30] sm:$0xff]  }
   0x4   :  { %277 = vmatprep.subr.bf16.mxu0 %v316_v1  ;;  %300 = vmatprep.subr.bf16.mxu1 %v316_v1  ;;  %v322_v9 = vld [vmem:[%s410_s1 + $0x38] sm:$0xff]   ;;  %v325_v10 = vld [vmem:[%s411_s0 + $0x8] sm:$0xff]   ;;  %v262_v12 = vld [vmem:[%s412_s2] ss:$0 sm:$0xff] }
   0x5   :  { %291 = vmatprep.mubr.bf16.mxu0 %v323_v4  ;;  %295 = vmatprep.mubr.bf16.mxu1 %v324_v5  ;;  %v326_v11 = vld [vmem:[%s411_s0 + $0x18] sm:$0xff]  }
   0x7   :  { %278 = vmatpush3.bf16.msra.mxu0 %v316_v1  ;;  %308 = vmatpush3.bf16.msra.mxu1 %v316_v1 }
   0x8   :  { %279 = vmatprep.subr.bf16.mxu0 %v317_v2  ;;  %301 = vmatprep.subr.bf16.mxu1 %v317_v2 }
   0xb   :  { %280 = vmatpush3.bf16.msra.mxu0 %v317_v2  ;;  %309 = vmatpush3.bf16.msra.mxu1 %v317_v2 }
   0xc   :  { %281 = vmatprep.subr.bf16.mxu0 %v318_v3  ;;  %302 = vmatprep.subr.bf16.mxu1 %v318_v3 }
   0xf   :  { %282 = vmatpush3.bf16.msra.mxu0 %v318_v3  ;;  %310 = vmatpush3.bf16.msra.mxu1 %v318_v3 }
  0x10   :  { %283 = vmatprep.subr.bf16.mxu0 %v319_v6  ;;  %303 = vmatprep.subr.bf16.mxu1 %v319_v6 }
  0x13   :  { %284 = vmatpush3.bf16.msra.mxu0 %v319_v6  ;;  %311 = vmatpush3.bf16.msra.mxu1 %v319_v6 }
  0x14   :  { %285 = vmatprep.subr.bf16.mxu0 %v320_v7  ;;  %304 = vmatprep.subr.bf16.mxu1 %v320_v7 }
  0x17   :  { %286 = vmatpush3.bf16.msra.mxu0 %v320_v7  ;;  %312 = vmatpush3.bf16.msra.mxu1 %v320_v7 }
  0x18   :  { %287 = vmatprep.subr.bf16.mxu0 %v321_v8  ;;  %305 = vmatprep.subr.bf16.mxu1 %v321_v8 }
  0x1b   :  { %288 = vmatpush3.bf16.msra.mxu0 %v321_v8  ;;  %313 = vmatpush3.bf16.msra.mxu1 %v321_v8 }
  0x1c   :  { %289 = vmatprep.subr.bf16.mxu0 %v322_v9  ;;  %306 = vmatprep.subr.bf16.mxu1 %v322_v9 }
  0x1f   :  { %290 = vmatpush3.bf16.msra.mxu0 %v322_v9  ;;  %314 = vmatpush3.bf16.msra.mxu1 %v322_v9 }
  0x22   :  { %292 = vmatmul.mubr.bf16.vlgmr.msra.gmra.mrb[0].mxu0 %v325_v10  ;;  %296 = vmatmul.mubr.bf16.vlgmr.msra.gmra.mrb[0].mxu1 %v326_v11 }
  0xf5   :  { %v293_v13 = vpop.f32.mrb[0].mxu0  ;;  %v297_v14 = vpop.f32.mrb[0].mxu1 }
  0xf6   :  { %v232_v15 = vadd.f32 %v293_v13, %v262_v12  ;;  %v236_v16 = vadd.f32 %v297_v14, %v262_v12  ;;  %v165_v17 = vpop.f32.mrb[1].mxu0  ;;  %v181_v18 = vpop.f32.mrb[1].mxu1 }
  0xf7   :  { %v230_v19 = vadd.f32 %v262_v12, %v165_v17  ;;  %v234_v20 = vadd.f32 %v262_v12, %v181_v18  ;;  %v294_v21 = vpop.f32.mrb[2].mxu0  ;;  %v298_v22 = vpop.f32.mrb[2].mxu1 }
  0xf8   :  { %240 = vst [vmem:[%s413_s3 + $0x10] sm:$0xff] %v232_v15  ;;  %244 = vst [vmem:[%s413_s3 + $0x30] sm:$0xff] %v236_v16  ;;  %v233_v23 = vadd.f32 %v294_v21, %v262_v12  ;;  %v237_v24 = vadd.f32 %v298_v22, %v262_v12  ;;  %v168_v25 = vpop.f32.mrb[3].mxu0  ;;  %v184_v26 = vpop.f32.mrb[3].mxu1 }
  0xf9   :  { %238 = vst [vmem:[%s413_s3] sm:$0xff] %v230_v19  ;;  %242 = vst [vmem:[%s413_s3 + $0x20] sm:$0xff] %v234_v20  ;;  %v231_v27 = vadd.f32 %v262_v12, %v168_v25  ;;  %v235_v28 = vadd.f32 %v262_v12, %v184_v26 }
  0xfa   :  { %241 = vst [vmem:[%s413_s3 + $0x18] sm:$0xff] %v233_v23  ;;  %245 = vst [vmem:[%s413_s3 + $0x38] sm:$0xff] %v237_v24 }
  0xfb   :  { %239 = vst [vmem:[%s413_s3 + $0x8] sm:$0xff] %v231_v27  ;;  %243 = vst [vmem:[%s413_s3 + $0x28] sm:$0xff] %v235_v28 }

// kernel: rnnlm_forward.2
= control target key start
LH: loop header
LB: loop body
LE: loop exit
PB: predicated region body
PF: predicated region fallthrough
CT: control target
= control target key end

     0   :  { %s2512_s27 = smov 0   ;;  %s2514_s28 = smov 0   ;;  %s3099_s0 = inlined_call_operand.vmem [shape: bf16[8,8,128], index: 0, kind: input, shape index: {}]   ;;  %s3100_s1 = inlined_call_operand.hbm [shape: bf16[128,512], index: 1, kind: input, shape index: {}]   ;;  %s3101_s2 = inlined_call_operand.hbm [shape: bf16[1,128,512], index: 2, kind: input, shape index: {}]   ;;  %s3102_s3 = inlined_call_operand.hbm [shape: bf16[2,128,512], index: 3, kind: input, shape index: {}]   ;;  %s3103_s4 = inlined_call_operand.vmem [shape: f32[2,8,128], index: 4, kind: input, shape index: {}]   ;;  %s3104_s5 = inlined_call_operand.vmem [shape: f32[2,8,128], index: 5, kind: input, shape index: {}]   ;;  %s3105_s6 = inlined_call_operand.vmem [shape: bf16[8,8,128], index: 6, kind: output, shape index: {0}]   ;;  %s3106_s7 = inlined_call_operand.vmem [shape: f32[2,8,128], index: 7, kind: output, shape index: {1}]   ;;  %s3107_s8 = inlined_call_operand.vmem [shape: f32[2,8,128], index: 8, kind: output, shape index: {2}]  }
   0x1   :  { %s2516_s29 = smov 0  }
   0x2 LB: > { %s28_s30 = sadd.s32 1, %s2433_s28  ;;  %p2174_p0 = scmp.ge.s32.totalorder %s2437_s29, 1  ;;  %s2437_s29 = sphi %s2516_s29, %s19_s29   ;;  %s2433_s28 = sphi %s2514_s28, %s3122_s28   ;;  %s2429_s27 = sphi %s2512_s27, %s3121_s27  }
   0x3   : > { %p29_p1 = scmp.ge.s32.totalorder %s28_s30, 2  ;;  %p233_p2 = scmp.lt.s32.totalorder %s2437_s29, 3 }
   0x5   : > { %s3124_s30 = smov (%p29_p1, %s28_s30), 0  ;;  %p234_p3 = pnand %p2174_p0, %p233_p2 }
   0x7   : > { %237 = sbr.rel (%p234_p3) target bundleno = 2235 (0x8bb), region = 32 }
   0xe   : > { %s2175_s9 = sshll.u32 %s2429_s27, 2  ;;  %p2179_p5 = scmp.ne.s32.totalorder %s2429_s27, 0 }
   0xf   : > { %p284_p4 = scmp.lt.s32.totalorder %s2175_s9, 7 }
  0x10   : > { %321 = sbr.rel (%p2179_p5) target bundleno = 67 (0x43), region = 36 }
  0x11   : > { %s3126_s9 = smov (!%p284_p4, %s2175_s9), 7 }
  0x12   : > { %s2176_s10 = sshll.u32 %s3126_s9, 2 }
  0x13   : > { %s2536_s13 = scalar_lea.vmem %s3099_s0, %s2176_s10  ;;  %s2541_s16 = scalar_lea.vmem %s3105_s6, %s2176_s10 }
  0x17   : > { %s326_s17 = sld [smem:[#allocation0]]   ;;  %s2439_s18 = smov [#allocation2]  }
  0x18   : > { %s334_s19 = sshll.u32 %s2439_s18, 4  ;;  %s2440_s20 = smov 512   ;;  %s335_s19 = int_to_ptr.vmem [resolvable:$true] %s334_s19 }
  0x19   : > { %338 = sst [smem:[#allocation10]] %s2440_s20  ;;  %s2441_s21 = smov 4  }
  0x1a   : > { %340 = sst [smem:[#allocation10 + $0x1]] %s2440_s20  ;;  %s2442_s22 = smov 64  }
  0x1b   : > { %342 = sst [smem:[#allocation10 + $0x2]] %s2441_s21  ;;  %s2443_s24 = smov 128  }
  0x1c   : > { %344 = sst [smem:[#allocation10 + $0x3]] %s2442_s22  ;;  %s2444_s26 = smov 2  }
  0x1d   : > { %s2180_s23 = sshll.u32 %s326_s17, 26  ;;  %346 = sst [smem:[#allocation10 + $0x4]] %s2443_s24 }
  0x1e   : > { %s2181_s25 = sadd.s32 134217728, %s2180_s23  ;;  %348 = sst [smem:[#allocation10 + $0x5]] %s2444_s26 }
  0x1f   : > { %s2445_s9 = smov 256   ;;  %352 = sst [smem:[#allocation10 + $0x7]] %s2442_s22 }
  0x20   : > { %350 = sst [smem:[#allocation10 + $0x6]] %s2445_s9  ;;  %s2446_s10 = smov [#allocation8]  }
  0x21   : > { %354 = sst [smem:[#allocation10 + $0x8]] %s2441_s21  ;;  %s2447_s11 = smov [#allocation9]  }
  0x22   : > { %356 = dma.general %s3100_s1, 4096, %s335_s19, %s2446_s10, %s2447_s11, [#allocation10], %s2181_s25, 0  }
  0x23   : > { %2421 = dma.done.wait [#allocation8], 4096 }
  0x24   : > { %2422 = vsyncadd [#allocation8], 4294963200 }
  0x25   : > { %s365_s15 = sld [smem:[#allocation0]]   ;;  %s2448_s18 = smov [#allocation3]  }
  0x26   : > { %s373_s17 = sshll.u32 %s2448_s18, 4  ;;  %s2449_s20 = smov 512   ;;  %s374_s17 = int_to_ptr.vmem [resolvable:$true] %s373_s17 }
  0x27   : > { %377 = sst [smem:[#allocation13]] %s2449_s20  ;;  %s2450_s23 = smov 4  }
  0x28   : > { %379 = sst [smem:[#allocation13 + $0x1]] %s2449_s20  ;;  %s2451_s24 = smov 64  }
  0x29   : > { %381 = sst [smem:[#allocation13 + $0x2]] %s2450_s23  ;;  %s2452_s22 = smov 128  }
  0x2a   : > { %383 = sst [smem:[#allocation13 + $0x3]] %s2451_s24  ;;  %s2453_s9 = smov 2  }
  0x2b   : > { %s2182_s21 = sshll.u32 %s365_s15, 26  ;;  %385 = sst [smem:[#allocation13 + $0x4]] %s2452_s22 }
  0x2c   : > { %s2183_s26 = sadd.s32 134217728, %s2182_s21  ;;  %387 = sst [smem:[#allocation13 + $0x5]] %s2453_s9 }
  0x2d   : > { %s2454_s19 = smov 256   ;;  %391 = sst [smem:[#allocation13 + $0x7]] %s2451_s24 }
  0x2e   : > { %389 = sst [smem:[#allocation13 + $0x6]] %s2454_s19  ;;  %s2455_s25 = smov [#allocation11]  }
  0x2f   : > { %393 = sst [smem:[#allocation13 + $0x8]] %s2450_s23  ;;  %s2456_s10 = smov [#allocation12]  }
  0x30   : > { %395 = dma.general %s3101_s2, 4096, %s374_s17, %s2455_s25, %s2456_s10, [#allocation13], %s2183_s26, 0  }
  0x31   : > { %2423 = dma.done.wait [#allocation11], 4096 }
  0x32   : > { %2424 = vsyncadd [#allocation11], 4294963200 }
  0x33   : > { %s405_s14 = sld [smem:[#allocation0]]   ;;  %s2457_s18 = smov [#allocation4]  }
  0x34   : > { %s413_s15 = sshll.u32 %s2457_s18, 4  ;;  %s2458_s20 = smov 512   ;;  %s414_s15 = int_to_ptr.vmem [resolvable:$true] %s413_s15 }
  0x35   : > { %417 = sst [smem:[#allocation16]] %s2458_s20  ;;  %s2459_s21 = smov 4  }
  0x36   : > { %419 = sst [smem:[#allocation16 + $0x1]] %s2458_s20  ;;  %s2460_s22 = smov 64  }
  0x37   : > { %421 = sst [smem:[#allocation16 + $0x2]] %s2459_s21  ;;  %s2461_s24 = smov 128  }
  0x38   : > { %423 = sst [smem:[#allocation16 + $0x3]] %s2460_s22  ;;  %s2462_s19 = smov 2  }
  0x39   : > { %s2184_s23 = sshll.u32 %s405_s14, 26  ;;  %425 = sst [smem:[#allocation16 + $0x4]] %s2461_s24 }
  0x3a   : > { %s2185_s9 = sadd.s32 134217728, %s2184_s23  ;;  %427 = sst [smem:[#allocation16 + $0x5]] %s2462_s19 }
  0x3b   : > { %s2463_s17 = smov 256   ;;  %431 = sst [smem:[#allocation16 + $0x7]] %s2460_s22 }
  0x3c   : > { %429 = sst [smem:[#allocation16 + $0x6]] %s2463_s17  ;;  %s2464_s26 = smov [#allocation14]  }
  0x3d   : > { %433 = sst [smem:[#allocation16 + $0x8]] %s2459_s21  ;;  %s2465_s25 = smov [#allocation15]  }
  0x3e   : > { %435 = dma.general %s3102_s3, 8192, %s414_s15, %s2464_s26, %s2465_s25, [#allocation16], %s2185_s9, 0  }
  0x3f   : > { %2425 = dma.done.wait [#allocation14], 8192 }
  0x40   : > { %2426 = vsyncadd [#allocation14], 4294959104  ;;  %v441_v0 = vld [vmem:[%s3103_s4] sm:$0xff]  ;;  %v442_v1 = vld [vmem:[%s3103_s4 + $0x8] sm:$0xff] }
  0x41   : > { %v445_v2 = vld [vmem:[%s3104_s5] sm:$0xff]  ;;  %443 = vst [vmem:[#allocation5] sm:$0xff] %v441_v0  ;;  %444 = vst [vmem:[#allocation5 + $0x8] sm:$0xff] %v442_v1  ;;  %v446_v3 = vld [vmem:[%s3104_s5 + $0x8] sm:$0xff] }
  0x42   : > { %447 = vst [vmem:[#allocation6] sm:$0xff] %v445_v2  ;;  %448 = vst [vmem:[#allocation6 + $0x8] sm:$0xff] %v446_v3 }
  0x43 PF: > { %v454_v4 = vld [vmem:[#allocation2 + $0x8] sm:$0xff]  ;;  %v456_v5 = vld [vmem:[#allocation2 + $0x18] sm:$0xff]  ;;  %v453_v6 = vld [vmem:[#allocation2] sm:$0xff]  ;;  %v3108_v14 = vmov 0   ;;  %p2220_p6 = scmp.ne.s32.totalorder %s2429_s27, 1 }
  0x44   : > { %497 = vmatprep.subr.bf16.mxu0 %v454_v4  ;;  %550 = vmatprep.subr.bf16.mxu1 %v456_v5  ;;  %v455_v7 = vld [vmem:[#allocation2 + $0x10] sm:$0xff]  ;;  %v458_v8 = vld [vmem:[#allocation2 + $0x28] sm:$0xff]  ;;  %v460_v9 = vld [vmem:[#allocation2 + $0x38] sm:$0xff] }
  0x45   : > { %498 = vmatpush1.bf16.msra.mxu0 %v453_v6  ;;  %551 = vmatpush1.bf16.msra.mxu1 %v455_v7  ;;  %v457_v10 = vld [vmem:[#allocation2 + $0x20] sm:$0xff]  ;;  %v459_v11 = vld [vmem:[#allocation2 + $0x30] sm:$0xff]  ;;  %v462_v12 = vld [vmem:[#allocation2 + $0x48] sm:$0xff] }
  0x46   : > { %499 = vmatprep.subr.bf16.mxu0 %v458_v8  ;;  %552 = vmatprep.subr.bf16.mxu1 %v460_v9  ;;  %v464_v13 = vld [vmem:[#allocation2 + $0x58] sm:$0xff]  ;;  %v461_v15 = vld [vmem:[#allocation2 + $0x40] sm:$0xff]  ;;  %v463_v16 = vld [vmem:[#allocation2 + $0x50] sm:$0xff] }
  0x47   : > { %529 = vmatprep.mubr.bf16.mxu0 %v3108_v14  ;;  %582 = vmatprep.mubr.bf16.mxu1 %v3108_v14  ;;  %v466_v17 = vld [vmem:[#allocation2 + $0x68] sm:$0xff]  ;;  %v468_v18 = vld [vmem:[#allocation2 + $0x78] sm:$0xff]  ;;  %v465_v19 = vld [vmem:[#allocation2 + $0x60] sm:$0xff] }
  0x48   : > { %v467_v20 = vld [vmem:[#allocation2 + $0x70] sm:$0xff]  ;;  %v470_v21 = vld [vmem:[#allocation2 + $0x88] sm:$0xff]  ;;  %v472_v22 = vld [vmem:[#allocation2 + $0x98] sm:$0xff] }
  0x49   : > { %500 = vmatpush1.bf16.msra.mxu0 %v457_v10  ;;  %553 = vmatpush1.bf16.msra.mxu1 %v459_v11  ;;  %v469_v23 = vld [vmem:[#allocation2 + $0x80] sm:$0xff]  ;;  %v471_v24 = vld [vmem:[#allocation2 + $0x90] sm:$0xff]  ;;  %v474_v25 = vld [vmem:[#allocation2 + $0xa8] sm:$0xff] }
  0x4a   : > { %501 = vmatprep.subr.bf16.mxu0 %v462_v12  ;;  %554 = vmatprep.subr.bf16.mxu1 %v464_v13  ;;  %v476_v26 = vld [vmem:[#allocation2 + $0xb8] sm:$0xff]  ;;  %v473_v27 = vld [vmem:[#allocation2 + $0xa0] sm:$0xff]  ;;  %v475_v28 = vld [vmem:[#allocation2 + $0xb0] sm:$0xff] }
  0x4b   : > { %v478_v29 = vld [vmem:[#allocation2 + $0xc8] sm:$0xff]  ;;  %v480_v30 = vld [vmem:[#allocation2 + $0xd8] sm:$0xff]  ;;  %v477_v31 = vld [vmem:[#allocation2 + $0xc0] sm:$0xff] }
  0x4c   : > { %v479_v32 = vld [vmem:[#allocation2 + $0xd0] sm:$0xff]  ;;  %v482_v33 = vld [vmem:[#allocation2 + $0xe8] sm:$0xff]  ;;  %v484_v34 = vld [vmem:[#allocation2 + $0xf8] sm:$0xff] }
  0x4d   : > { %502 = vmatpush1.bf16.msra.mxu0 %v461_v15  ;;  %555 = vmatpush1.bf16.msra.mxu1 %v463_v16  ;;  %v481_v35 = vld [vmem:[#allocation2 + $0xe0] sm:$0xff]  ;;  %v483_v36 = vld [vmem:[#allocation2 + $0xf0] sm:$0xff]  ;;  %v2567_v37 = vld [vmem:[#allocation4 + $0x8] sm:$0xff] }
  0x4e   : > { %503 = vmatprep.subr.bf16.mxu0 %v466_v17  ;;  %556 = vmatprep.subr.bf16.mxu1 %v468_v18  ;;  %v2569_v38 = vld [vmem:[#allocation4 + $0x18] sm:$0xff]  ;;  %v2277_v39 = vld [vmem:[%s2536_s13] sm:$0xff]   ;;  %v2576_v41 = vld [vmem:[#allocation4 + $0x10] sm:$0xff] }
  0x4f   : > { %v2574_v40 = vld [vmem:[#allocation4] sm:$0xff]  ;;  %v2578_v42 = vld [vmem:[#allocation4 + $0x28] sm:$0xff]  ;;  %v2580_v43 = vld [vmem:[#allocation4 + $0x38] sm:$0xff] }
  0x50   : > { %v2586_v44 = vld [vmem:[#allocation4 + $0x20] sm:$0xff]  ;;  %v2588_v45 = vld [vmem:[#allocation4 + $0x30] sm:$0xff]  ;;  %v2590_v46 = vld [vmem:[#allocation4 + $0x48] sm:$0xff] }
  0x51   : > { %504 = vmatpush1.bf16.msra.mxu0 %v465_v19  ;;  %557 = vmatpush1.bf16.msra.mxu1 %v467_v20  ;;  %v2592_v47 = vld [vmem:[#allocation4 + $0x58] sm:$0xff]  ;;  %v2278_v48 = vld [vmem:[%s2536_s13 + $0x8] sm:$0xff]   ;;  %v2601_v49 = vld [vmem:[#allocation4 + $0x40] sm:$0xff] }
  0x52   : > { %505 = vmatprep.subr.bf16.mxu0 %v470_v21  ;;  %558 = vmatprep.subr.bf16.mxu1 %v472_v22  ;;  %v2603_v50 = vld [vmem:[#allocation4 + $0x50] sm:$0xff]  ;;  %v2605_v51 = vld [vmem:[#allocation4 + $0x68] sm:$0xff]  ;;  %v2607_v52 = vld [vmem:[#allocation4 + $0x78] sm:$0xff] }
  0x53   : > { %v2613_v53 = vld [vmem:[#allocation4 + $0x60] sm:$0xff]  ;;  %v2615_v54 = vld [vmem:[#allocation4 + $0x70] sm:$0xff]  ;;  %v2617_v55 = vld [vmem:[#allocation4 + $0x88] sm:$0xff] }
  0x54   : > { %v2619_v56 = vld [vmem:[#allocation4 + $0x98] sm:$0xff]  ;;  %v2627_v57 = vld [vmem:[#allocation4 + $0x80] sm:$0xff]  ;;  %v2629_v58 = vld [vmem:[#allocation4 + $0x90] sm:$0xff] }
  0x55   : > { %506 = vmatpush1.bf16.msra.mxu0 %v469_v23  ;;  %559 = vmatpush1.bf16.msra.mxu1 %v471_v24  ;;  %v2631_v59 = vld [vmem:[#allocation4 + $0xa8] sm:$0xff]  ;;  %v2633_v60 = vld [vmem:[#allocation4 + $0xb8] sm:$0xff]  ;;  %v2639_v61 = vld [vmem:[#allocation4 + $0xa0] sm:$0xff] }
  0x56   : > { %507 = vmatprep.subr.bf16.mxu0 %v474_v25  ;;  %560 = vmatprep.subr.bf16.mxu1 %v476_v26  ;;  %v2641_v62 = vld [vmem:[#allocation4 + $0xb0] sm:$0xff]  ;;  %v2643_v63 = vld [vmem:[#allocation4 + $0xc8] sm:$0xff]  ;;  %v2645_v0 = vld [vmem:[#allocation4 + $0xd8] sm:$0xff] }
  0x57   : > { %v2651_v1 = vld [vmem:[#allocation4 + $0xc0] sm:$0xff]  ;;  %v2653_v2 = vld [vmem:[#allocation4 + $0xd0] sm:$0xff]  ;;  %v2655_v3 = vld [vmem:[#allocation4 + $0xe8] sm:$0xff] }
  0x58   : > { %v2657_v4 = vld [vmem:[#allocation4 + $0xf8] sm:$0xff]  ;;  %v619_v5 = vld [vmem:[#allocation5] sm:$0xff]  ;;  %v2665_v7 = vld [vmem:[#allocation4 + $0xf0] sm:$0xff] }
  0x59   : > { %508 = vmatpush1.bf16.msra.mxu0 %v473_v27  ;;  %561 = vmatpush1.bf16.msra.mxu1 %v475_v28  ;;  %v2663_v6 = vld [vmem:[#allocation4 + $0xe0] sm:$0xff]  ;;  %v625_v8 = vpack.c.bf16 %v619_v5, %v619_v5 }
  0x5a   : > { %509 = vmatprep.subr.bf16.mxu0 %v478_v29  ;;  %562 = vmatprep.subr.bf16.mxu1 %v480_v30 }
  0x5d   : > { %510 = vmatpush1.bf16.msra.mxu0 %v477_v31  ;;  %563 = vmatpush1.bf16.msra.mxu1 %v479_v32 }
  0x5e   : > { %511 = vmatprep.subr.bf16.mxu0 %v482_v33  ;;  %564 = vmatprep.subr.bf16.mxu1 %v484_v34 }
  0x61   : > { %512 = vmatpush1.bf16.msra.mxu0 %v481_v35  ;;  %565 = vmatpush1.bf16.msra.mxu1 %v483_v36 }
  0x62   : > { %658 = vmatprep.subr.bf16.mxu0 %v2567_v37  ;;  %699 = vmatprep.subr.bf16.mxu1 %v2569_v38 }
  0x64   : > { %530 = vmatmul.mubr.bf16.vlgmr.msra.gmra.mrb[0].mxu0 %v2277_v39  ;;  %583 = vmatmul.mubr.bf16.vlgmr.msra.gmra.mrb[0].mxu1 %v2277_v39 }
  0x65   : > { %659 = vmatpush1.bf16.msra.mxu0 %v2574_v40  ;;  %700 = vmatpush1.bf16.msra.mxu1 %v2576_v41 }
  0x66   : > { %660 = vmatprep.subr.bf16.mxu0 %v2578_v42  ;;  %701 = vmatprep.subr.bf16.mxu1 %v2580_v43 }
  0x67   : > { %539 = vmatprep.mubr.bf16.mxu0 %v3108_v14  ;;  %592 = vmatprep.mubr.bf16.mxu1 %v3108_v14 }
  0x69   : > { %661 = vmatpush1.bf16.msra.mxu0 %v2586_v44  ;;  %702 = vmatpush1.bf16.msra.mxu1 %v2588_v45 }
  0x6a   : > { %662 = vmatprep.subr.bf16.mxu0 %v2590_v46  ;;  %703 = vmatprep.subr.bf16.mxu1 %v2592_v47 }
  0x6c   : > { %540 = vmatmul.mubr.bf16.gmra.mrb[4].mxu0 %v2278_v48  ;;  %593 = vmatmul.mubr.bf16.gmra.mrb[4].mxu1 %v2278_v48 }
  0x6d   : > { %663 = vmatpush1.bf16.msra.mxu0 %v2601_v49  ;;  %704 = vmatpush1.bf16.msra.mxu1 %v2603_v50 }
  0x6e   : > { %664 = vmatprep.subr.bf16.mxu0 %v2605_v51  ;;  %705 = vmatprep.subr.bf16.mxu1 %v2607_v52 }
  0x6f   : > { %690 = vmatprep.mubr.bf16.mxu0 %v3108_v14  ;;  %731 = vmatprep.mubr.bf16.mxu1 %v3108_v14 }
  0x71   : > { %665 = vmatpush1.bf16.msra.mxu0 %v2613_v53  ;;  %706 = vmatpush1.bf16.msra.mxu1 %v2615_v54 }
  0x72   : > { %666 = vmatprep.subr.bf16.mxu0 %v2617_v55  ;;  %707 = vmatprep.subr.bf16.mxu1 %v2619_v56 }
  0x75   : > { %667 = vmatpush1.bf16.msra.mxu0 %v2627_v57  ;;  %708 = vmatpush1.bf16.msra.mxu1 %v2629_v58 }
  0x76   : > { %668 = vmatprep.subr.bf16.mxu0 %v2631_v59  ;;  %709 = vmatprep.subr.bf16.mxu1 %v2633_v60 }
  0x79   : > { %669 = vmatpush1.bf16.msra.mxu0 %v2639_v61  ;;  %710 = vmatpush1.bf16.msra.mxu1 %v2641_v62 }
  0x7a   : > { %670 = vmatprep.subr.bf16.mxu0 %v2643_v63  ;;  %711 = vmatprep.subr.bf16.mxu1 %v2645_v0 }
  0x7d   : > { %671 = vmatpush1.bf16.msra.mxu0 %v2651_v1  ;;  %712 = vmatpush1.bf16.msra.mxu1 %v2653_v2 }
  0x7e   : > { %672 = vmatprep.subr.bf16.mxu0 %v2655_v3  ;;  %713 = vmatprep.subr.bf16.mxu1 %v2657_v4 }
  0x81   : > { %673 = vmatpush1.bf16.msra.mxu0 %v2663_v6  ;;  %714 = vmatpush1.bf16.msra.mxu1 %v2665_v7 }
  0x82   : > { %807 = vmatprep.subr.bf16.mxu0 %v2567_v37  ;;  %848 = vmatprep.subr.bf16.mxu1 %v2569_v38 }
  0x84   : > { %691 = vmatmul.mubr.bf16.vlgmr.msra.gmra.mrb[8].mxu0 %v625_v8  ;;  %732 = vmatmul.mubr.bf16.vlgmr.msra.gmra.mrb[8].mxu1 %v625_v8 }
  0x85   : > { %808 = vmatpush1.bf16.msra.mxu0 %v2574_v40  ;;  %849 = vmatpush1.bf16.msra.mxu1 %v2576_v41 }
  0x86   : > { %809 = vmatprep.subr.bf16.mxu0 %v2578_v42  ;;  %850 = vmatprep.subr.bf16.mxu1 %v2580_v43 }
  0x87   : > { %839 = vmatprep.mubr.bf16.mxu0 %v3108_v14  ;;  %880 = vmatprep.mubr.bf16.mxu1 %v3108_v14 }
  0x89   : > { %810 = vmatpush1.bf16.msra.mxu0 %v2586_v44  ;;  %851 = vmatpush1.bf16.msra.mxu1 %v2588_v45 }
  0x8a   : > { %811 = vmatprep.subr.bf16.mxu0 %v2590_v46  ;;  %852 = vmatprep.subr.bf16.mxu1 %v2592_v47 }
  0x8d   : > { %812 = vmatpush1.bf16.msra.mxu0 %v2601_v49  ;;  %853 = vmatpush1.bf16.msra.mxu1 %v2603_v50 }
  0x8e   : > { %813 = vmatprep.subr.bf16.mxu0 %v2605_v51  ;;  %854 = vmatprep.subr.bf16.mxu1 %v2607_v52 }
  0x91   : > { %814 = vmatpush1.bf16.msra.mxu0 %v2613_v53  ;;  %855 = vmatpush1.bf16.msra.mxu1 %v2615_v54 }
  0x92   : > { %815 = vmatprep.subr.bf16.mxu0 %v2617_v55  ;;  %856 = vmatprep.subr.bf16.mxu1 %v2619_v56 }
  0x95   : > { %816 = vmatpush1.bf16.msra.mxu0 %v2627_v57  ;;  %857 = vmatpush1.bf16.msra.mxu1 %v2629_v58 }
  0x96   : > { %817 = vmatprep.subr.bf16.mxu0 %v2631_v59  ;;  %858 = vmatprep.subr.bf16.mxu1 %v2633_v60 }
  0x99   : > { %818 = vmatpush1.bf16.msra.mxu0 %v2639_v61  ;;  %859 = vmatpush1.bf16.msra.mxu1 %v2641_v62 }
  0x9a   : > { %819 = vmatprep.subr.bf16.mxu0 %v2643_v63  ;;  %860 = vmatprep.subr.bf16.mxu1 %v2645_v0 }
  0x9d   : > { %820 = vmatpush1.bf16.msra.mxu0 %v2651_v1  ;;  %861 = vmatpush1.bf16.msra.mxu1 %v2653_v2 }
  0x9e   : > { %821 = vmatprep.subr.bf16.mxu0 %v2655_v3  ;;  %862 = vmatprep.subr.bf16.mxu1 %v2657_v4 }
  0xa1   : > { %822 = vmatpush1.bf16.msra.mxu0 %v2663_v6  ;;  %863 = vmatpush1.bf16.msra.mxu1 %v2665_v7 }
  0xa2   : > { %957 = vmatprep.subr.bf16.mxu0 %v2567_v37  ;;  %998 = vmatprep.subr.bf16.mxu1 %v2569_v38 }
 0x137   : > { %v531_v9 = vpop.f32.mrb[0].mxu0  ;;  %v584_v10 = vpop.f32.mrb[0].mxu1 }
 0x138   : > { %v533_v11 = vpop.f32.mrb[1].mxu0  ;;  %v586_v12 = vpop.f32.mrb[1].mxu1 }
 0x139   : > { %v2705_v13 = vpop.f32.mrb[2].mxu0  ;;  %v2707_v15 = vpop.f32.mrb[2].mxu1 }
 0x13a   : > { %v2709_v16 = vpop.f32.mrb[3].mxu0  ;;  %v2711_v17 = vpop.f32.mrb[3].mxu1 }
 0x13f   : > { %v2713_v18 = vpop.f32.mrb[4].mxu0  ;;  %v2715_v19 = vpop.f32.mrb[4].mxu1 }
 0x140   : > { %v2717_v20 = vpop.f32.mrb[5].mxu0  ;;  %v2719_v21 = vpop.f32.mrb[5].mxu1 }
 0x141   : > { %v2721_v22 = vpop.f32.mrb[6].mxu0  ;;  %v2723_v23 = vpop.f32.mrb[6].mxu1 }
 0x142   : > { %v2725_v24 = vpop.f32.mrb[7].mxu0  ;;  %v2727_v25 = vpop.f32.mrb[7].mxu1 }
 0x143   : > { %3110 = vst [vmem:[#allocation20_spill] sm:$0xff] %v2725_v24  ;;  %3111 = vst [vmem:[#allocation21_spill] sm:$0xff] %v2727_v25 }
 0x157   : > { %v692_v26 = vpop.f32.mrb[8].mxu0  ;;  %v733_v27 = vpop.f32.mrb[8].mxu1 }
 0x158   : > { %v740_v28 = vadd.f32 %v692_v26, %v531_v9  ;;  %v742_v29 = vadd.f32 %v733_v27, %v584_v10  ;;  %v694_v30 = vpop.f32.mrb[9].mxu0  ;;  %v735_v31 = vpop.f32.mrb[9].mxu1 }
 0x159   : > { %v741_v32 = vadd.f32 %v694_v30, %v533_v11  ;;  %v743_v33 = vadd.f32 %v735_v31, %v586_v12  ;;  %v696_v34 = vpop.f32.mrb[10].mxu0  ;;  %v737_v35 = vpop.f32.mrb[10].mxu1  ;;  %v620_v12 = vld [vmem:[#allocation6] sm:$0xff] }
 0x15a   : > { %v2188_v36 = vmul.f32 -1.442695, %v740_v28  ;;  %v697_v39 = vpop.f32.mrb[11].mxu0  ;;  %v738_v48 = vpop.f32.mrb[11].mxu1 }
 0x15b   : > { %v2189_v5 = vmul.f32 -1.442695, %v741_v32  ;;  %v2190_v8 = vmul.f32 -1.442695, %v743_v33 }
 0x15c   : > { %2281 = vpow2.f32 %v2188_v36 }
 0x15d   : > { %2283 = vpow2.f32 %v2189_v5 }
 0x15e   : > { %2285 = vpow2.f32 %v2190_v8 }
 0x15f   : > { %2287 = vtanh.f32 %v742_v29 }
 0x166   : > { %v2282_v14 = vpop.eup %2281 }
 0x167   : > { %v2284_v24 = vpop.eup %2283  ;;  %v747_v25 = vadd.f32 1.0, %v2282_v14 }
 0x168   : > { %v753_v9 = vadd.f32 1.0, %v2284_v24  ;;  %v2286_v10 = vpop.eup %2285 }
 0x169   : > { %2289 = vrcp.f32 %v747_v25  ;;  %v2288_v11 = vpop.eup %2287  ;;  %v760_v30 = vadd.f32 1.0, %v2286_v10  ;;  %v3112_v25 = vmov 0  }
 0x16a   : > { %2291 = vrcp.f32 %v753_v9 }
 0x16b   : > { %2293 = vrcp.f32 %v760_v30 }
 0x173   : > { %v2290_v26 = vpop.eup %2289 }
 0x174   : > { %v2292_v27 = vpop.eup %2291  ;;  %v764_v28 = vmul.f32 %v2290_v26, %v2288_v11 }
 0x175   : > { %v763_v31 = vmul.f32 %v2292_v27, %v620_v12  ;;  %v2294_v14 = vpop.eup %2293 }
 0x177   : > { %v2729_v32 = vadd.f32 %v764_v28, %v763_v31 }
 0x179   : > { %2295 = vtanh.f32 %v2729_v32 }
 0x183   : > { %v2296_v33 = vpop.eup %2295 }
 0x184   : > { %v767_v29 = vmul.f32 %v2296_v33, %v2294_v14 }
 0x186   : > { %v768_v24 = vpack.c.bf16 %v767_v29, %v767_v29 }
 0x188   : > { %769 = vst [vmem:[%s2541_s16] sm:$0xf] %v768_v24  ;;  %840 = vmatmul.mubr.bf16.vlgmr.msra.gmra.mrb[12].mxu0 %v768_v24  ;;  %881 = vmatmul.mubr.bf16.vlgmr.msra.gmra.mrb[12].mxu1 %v768_v24 }
 0x189   : > { %958 = vmatpush1.bf16.msra.mxu0 %v2574_v40  ;;  %999 = vmatpush1.bf16.msra.mxu1 %v2576_v41 }
 0x18a   : > { %959 = vmatprep.subr.bf16.mxu0 %v2578_v42  ;;  %1000 = vmatprep.subr.bf16.mxu1 %v2580_v43 }
 0x18b   : > { %989 = vmatprep.mubr.bf16.mxu0 %v3112_v25  ;;  %1030 = vmatprep.mubr.bf16.mxu1 %v3112_v25 }
 0x18d   : > { %960 = vmatpush1.bf16.msra.mxu0 %v2586_v44  ;;  %1001 = vmatpush1.bf16.msra.mxu1 %v2588_v45 }
 0x18e   : > { %961 = vmatprep.subr.bf16.mxu0 %v2590_v46  ;;  %1002 = vmatprep.subr.bf16.mxu1 %v2592_v47 }
 0x191   : > { %962 = vmatpush1.bf16.msra.mxu0 %v2601_v49  ;;  %1003 = vmatpush1.bf16.msra.mxu1 %v2603_v50 }
 0x192   : > { %963 = vmatprep.subr.bf16.mxu0 %v2605_v51  ;;  %1004 = vmatprep.subr.bf16.mxu1 %v2607_v52 }
 0x195   : > { %964 = vmatpush1.bf16.msra.mxu0 %v2613_v53  ;;  %1005 = vmatpush1.bf16.msra.mxu1 %v2615_v54 }
 0x196   : > { %965 = vmatprep.subr.bf16.mxu0 %v2617_v55  ;;  %1006 = vmatprep.subr.bf16.mxu1 %v2619_v56 }
 0x199   : > { %966 = vmatpush1.bf16.msra.mxu0 %v2627_v57  ;;  %1007 = vmatpush1.bf16.msra.mxu1 %v2629_v58 }
 0x19a   : > { %967 = vmatprep.subr.bf16.mxu0 %v2631_v59  ;;  %1008 = vmatprep.subr.bf16.mxu1 %v2633_v60 }
 0x19d   : > { %968 = vmatpush1.bf16.msra.mxu0 %v2639_v61  ;;  %1009 = vmatpush1.bf16.msra.mxu1 %v2641_v62 }
 0x19e   : > { %969 = vmatprep.subr.bf16.mxu0 %v2643_v63  ;;  %1010 = vmatprep.subr.bf16.mxu1 %v2645_v0 }
 0x1a1   : > { %970 = vmatpush1.bf16.msra.mxu0 %v2651_v1  ;;  %1011 = vmatpush1.bf16.msra.mxu1 %v2653_v2 }
 0x1a2   : > { %971 = vmatprep.subr.bf16.mxu0 %v2655_v3  ;;  %1012 = vmatprep.subr.bf16.mxu1 %v2657_v4 }
 0x1a5   : > { %972 = vmatpush1.bf16.msra.mxu0 %v2663_v6  ;;  %1013 = vmatpush1.bf16.msra.mxu1 %v2665_v7 }
 0x1a6   : > { %1107 = vmatprep.subr.bf16.mxu0 %v2567_v37  ;;  %1148 = vmatprep.subr.bf16.mxu1 %v2569_v38 }
 0x25b   : > { %v841_v34 = vpop.f32.mrb[12].mxu0  ;;  %v882_v35 = vpop.f32.mrb[12].mxu1 }
 0x25c   : > { %v889_v36 = vadd.f32 %v841_v34, %v2705_v13  ;;  %v891_v39 = vadd.f32 %v882_v35, %v2707_v15  ;;  %v843_v48 = vpop.f32.mrb[13].mxu0  ;;  %v884_v5 = vpop.f32.mrb[13].mxu1 }
 0x25d   : > { %v890_v8 = vadd.f32 %v843_v48, %v2709_v16  ;;  %v892_v9 = vadd.f32 %v884_v5, %v2711_v17  ;;  %v845_v10 = vpop.f32.mrb[14].mxu0  ;;  %v886_v11 = vpop.f32.mrb[14].mxu1  ;;  %v1231_v5 = vld [vmem:[#allocation3 + $0x28] sm:$0xff] }
 0x25e   : > { %v2191_v12 = vmul.f32 -1.442695, %v889_v36  ;;  %v846_v26 = vpop.f32.mrb[15].mxu0  ;;  %v887_v27 = vpop.f32.mrb[15].mxu1  ;;  %v1232_v10 = vld [vmem:[#allocation3 + $0x30] sm:$0xff]  ;;  %v1235_v11 = vld [vmem:[#allocation3 + $0x48] sm:$0xff] }
 0x25f   : > { %v2192_v37 = vmul.f32 -1.442695, %v890_v8  ;;  %v2193_v38 = vmul.f32 -1.442695, %v892_v9  ;;  %v1233_v8 = vld [vmem:[#allocation3 + $0x38] sm:$0xff]  ;;  %v1230_v9 = vld [vmem:[#allocation3 + $0x20] sm:$0xff] }
 0x260   : > { %2297 = vpow2.f32 %v2191_v12  ;;  %v1237_v12 = vld [vmem:[#allocation3 + $0x58] sm:$0xff]  ;;  %v1234_v26 = vld [vmem:[#allocation3 + $0x40] sm:$0xff]  ;;  %v1236_v27 = vld [vmem:[#allocation3 + $0x50] sm:$0xff] }
 0x261   : > { %2299 = vpow2.f32 %v2192_v37  ;;  %v1239_v37 = vld [vmem:[#allocation3 + $0x68] sm:$0xff] }
 0x262   : > { %2301 = vpow2.f32 %v2193_v38  ;;  %v1241_v38 = vld [vmem:[#allocation3 + $0x78] sm:$0xff] }
 0x263   : > { %2303 = vtanh.f32 %v891_v39 }
 0x26a   : > { %v2298_v28 = vpop.eup %2297 }
 0x26b   : > { %v2300_v30 = vpop.eup %2299  ;;  %v896_v13 = vadd.f32 1.0, %v2298_v28  ;;  %v1238_v28 = vld [vmem:[#allocation3 + $0x60] sm:$0xff] }
 0x26c   : > { %v902_v15 = vadd.f32 1.0, %v2300_v30  ;;  %v2302_v16 = vpop.eup %2301  ;;  %v1240_v30 = vld [vmem:[#allocation3 + $0x70] sm:$0xff] }
 0x26d   : > { %2305 = vrcp.f32 %v896_v13  ;;  %v2304_v17 = vpop.eup %2303  ;;  %v909_v29 = vadd.f32 1.0, %v2302_v16  ;;  %v1243_v13 = vld [vmem:[#allocation3 + $0x88] sm:$0xff]  ;;  %v1242_v16 = vld [vmem:[#allocation3 + $0x80] sm:$0xff] }
 0x26e   : > { %2307 = vrcp.f32 %v902_v15  ;;  %v1245_v15 = vld [vmem:[#allocation3 + $0x98] sm:$0xff] }
 0x26f   : > { %2309 = vrcp.f32 %v909_v29  ;;  %v1248_v29 = vld [vmem:[#allocation3 + $0xb0] sm:$0xff] }
 0x277   : > { %v2306_v31 = vpop.eup %2305 }
 0x278   : > { %v2308_v14 = vpop.eup %2307  ;;  %v913_v33 = vmul.f32 %v2306_v31, %v2304_v17  ;;  %v1244_v17 = vld [vmem:[#allocation3 + $0x90] sm:$0xff]  ;;  %v1247_v31 = vld [vmem:[#allocation3 + $0xa8] sm:$0xff] }
 0x279   : > { %v912_v24 = vmul.f32 %v2308_v14, %v2729_v32  ;;  %v2310_v35 = vpop.eup %2309  ;;  %v1228_v32 = vld [vmem:[#allocation3 + $0x10] sm:$0xff]  ;;  %v1249_v14 = vld [vmem:[#allocation3 + $0xb8] sm:$0xff] }
 0x27b   : > { %v2772_v34 = vadd.f32 %v913_v33, %v912_v24  ;;  %v1246_v33 = vld [vmem:[#allocation3 + $0xa0] sm:$0xff]  ;;  %v1251_v24 = vld [vmem:[#allocation3 + $0xc8] sm:$0xff] }
 0x27d   : > { %2311 = vtanh.f32 %v2772_v34 }
 0x287   : > { %v2312_v36 = vpop.eup %2311 }
 0x288   : > { %v916_v39 = vmul.f32 %v2312_v36, %v2310_v35  ;;  %v1250_v35 = vld [vmem:[#allocation3 + $0xc0] sm:$0xff]  ;;  %v1252_v36 = vld [vmem:[#allocation3 + $0xd0] sm:$0xff] }
 0x28a   : > { %v917_v48 = vpack.c.bf16 %v916_v39, %v916_v39  ;;  %v1255_v39 = vld [vmem:[#allocation3 + $0xe8] sm:$0xff] }
 0x28c   : > { %2194 = vst [vmem:[%s2541_s16 + $0x4] sm:$0xf] %v917_v48  ;;  %990 = vmatmul.mubr.bf16.vlgmr.msra.gmra.mrb[16].mxu0 %v917_v48  ;;  %1031 = vmatmul.mubr.bf16.vlgmr.msra.gmra.mrb[16].mxu1 %v917_v48  ;;  %v1257_v48 = vld [vmem:[#allocation3 + $0xf8] sm:$0xff] }
 0x28d   : > { %1108 = vmatpush1.bf16.msra.mxu0 %v2574_v40  ;;  %1149 = vmatpush1.bf16.msra.mxu1 %v2576_v41 }
 0x28e   : > { %1109 = vmatprep.subr.bf16.mxu0 %v2578_v42  ;;  %1150 = vmatprep.subr.bf16.mxu1 %v2580_v43 }
 0x28f   : > { %1139 = vmatprep.mubr.bf16.mxu0 %v3112_v25  ;;  %1180 = vmatprep.mubr.bf16.mxu1 %v3112_v25 }
 0x291   : > { %1110 = vmatpush1.bf16.msra.mxu0 %v2586_v44  ;;  %1151 = vmatpush1.bf16.msra.mxu1 %v2588_v45 }
 0x292   : > { %1111 = vmatprep.subr.bf16.mxu0 %v2590_v46  ;;  %1152 = vmatprep.subr.bf16.mxu1 %v2592_v47 }
 0x295   : > { %1112 = vmatpush1.bf16.msra.mxu0 %v2601_v49  ;;  %1153 = vmatpush1.bf16.msra.mxu1 %v2603_v50 }
 0x296   : > { %1113 = vmatprep.subr.bf16.mxu0 %v2605_v51  ;;  %1154 = vmatprep.subr.bf16.mxu1 %v2607_v52 }
 0x299   : > { %1114 = vmatpush1.bf16.msra.mxu0 %v2613_v53  ;;  %1155 = vmatpush1.bf16.msra.mxu1 %v2615_v54 }
 0x29a   : > { %1115 = vmatprep.subr.bf16.mxu0 %v2617_v55  ;;  %1156 = vmatprep.subr.bf16.mxu1 %v2619_v56 }
 0x29d   : > { %1116 = vmatpush1.bf16.msra.mxu0 %v2627_v57  ;;  %1157 = vmatpush1.bf16.msra.mxu1 %v2629_v58 }
 0x29e   : > { %1117 = vmatprep.subr.bf16.mxu0 %v2631_v59  ;;  %1158 = vmatprep.subr.bf16.mxu1 %v2633_v60 }
 0x2a1   : > { %1118 = vmatpush1.bf16.msra.mxu0 %v2639_v61  ;;  %1159 = vmatpush1.bf16.msra.mxu1 %v2641_v62 }
 0x2a2   : > { %1119 = vmatprep.subr.bf16.mxu0 %v2643_v63  ;;  %1160 = vmatprep.subr.bf16.mxu1 %v2645_v0 }
 0x2a5   : > { %1120 = vmatpush1.bf16.msra.mxu0 %v2651_v1  ;;  %1161 = vmatpush1.bf16.msra.mxu1 %v2653_v2 }
 0x2a6   : > { %1121 = vmatprep.subr.bf16.mxu0 %v2655_v3  ;;  %1162 = vmatprep.subr.bf16.mxu1 %v2657_v4 }
 0x2a9   : > { %1122 = vmatpush1.bf16.msra.mxu0 %v2663_v6  ;;  %1163 = vmatpush1.bf16.msra.mxu1 %v2665_v7 }
 0x35f   : > { %v991_v40 = vpop.f32.mrb[16].mxu0  ;;  %v1032_v41 = vpop.f32.mrb[16].mxu1 }
 0x360   : > { %v1039_v42 = vadd.f32 %v991_v40, %v2713_v18  ;;  %v1041_v43 = vadd.f32 %v1032_v41, %v2715_v19  ;;  %v993_v44 = vpop.f32.mrb[17].mxu0  ;;  %v1034_v45 = vpop.f32.mrb[17].mxu1  ;;  %v1227_v19 = vld [vmem:[#allocation3 + $0x8] sm:$0xff]  ;;  %v1254_v40 = vld [vmem:[#allocation3 + $0xe0] sm:$0xff]  ;;  %v1256_v41 = vld [vmem:[#allocation3 + $0xf0] sm:$0xff] }
 0x361   : > { %v1040_v46 = vadd.f32 %v993_v44, %v2717_v20  ;;  %v1042_v47 = vadd.f32 %v1034_v45, %v2719_v21  ;;  %v995_v49 = vpop.f32.mrb[18].mxu0  ;;  %v1036_v50 = vpop.f32.mrb[18].mxu1  ;;  %v1229_v20 = vld [vmem:[#allocation3 + $0x18] sm:$0xff]  ;;  %1270 = vmatprep.subr.bf16.mxu0 %v1227_v19  ;;  %v1226_v21 = vld [vmem:[#allocation3] sm:$0xff] }
 0x362   : > { %v2195_v51 = vmul.f32 -1.442695, %v1039_v42  ;;  %v996_v52 = vpop.f32.mrb[19].mxu0  ;;  %v1037_v53 = vpop.f32.mrb[19].mxu1  ;;  %1323 = vmatprep.subr.bf16.mxu1 %v1229_v20  ;;  %v2819_v42 = vld [vmem:[#allocation4 + $0x108] sm:$0xff] }
 0x363   : > { %v2196_v54 = vmul.f32 -1.442695, %v1040_v46  ;;  %v2197_v55 = vmul.f32 -1.442695, %v1042_v47  ;;  %v3114_v53 = vld [vmem:[#allocation21_spill] sm:$0xff] }
 0x364   : > { %2313 = vpow2.f32 %v2195_v51  ;;  %v3113_v51 = vld [vmem:[#allocation20_spill] sm:$0xff] }
 0x365   : > { %2315 = vpow2.f32 %v2196_v54 }
 0x366   : > { %2317 = vpow2.f32 %v2197_v55 }
 0x367   : > { %2319 = vtanh.f32 %v1041_v43  ;;  %v2821_v43 = vld [vmem:[#allocation4 + $0x118] sm:$0xff] }
 0x36e   : > { %v2314_v56 = vpop.eup %2313 }
 0x36f   : > { %v2316_v57 = vpop.eup %2315  ;;  %v1046_v58 = vadd.f32 1.0, %v2314_v56 }
 0x370   : > { %v1052_v59 = vadd.f32 1.0, %v2316_v57  ;;  %v2318_v60 = vpop.eup %2317 }
 0x371   : > { %2321 = vrcp.f32 %v1046_v58  ;;  %v2320_v61 = vpop.eup %2319  ;;  %v1059_v1 = vadd.f32 1.0, %v2318_v60 }
 0x372   : > { %2323 = vrcp.f32 %v1052_v59 }
 0x373   : > { %2325 = vrcp.f32 %v1059_v1 }
 0x37b   : > { %v2322_v62 = vpop.eup %2321 }
 0x37c   : > { %v2324_v63 = vpop.eup %2323  ;;  %v1063_v0 = vmul.f32 %v2322_v62, %v2320_v61 }
 0x37d   : > { %v1062_v2 = vmul.f32 %v2324_v63, %v2772_v34  ;;  %v2326_v4 = vpop.eup %2325  ;;  %v1253_v34 = vld [vmem:[#allocation3 + $0xd8] sm:$0xff] }
 0x37f   : > { %v2813_v3 = vadd.f32 %v1063_v0, %v1062_v2 }
 0x381   : > { %2327 = vtanh.f32 %v2813_v3 }
 0x38b   : > { %v2328_v6 = vpop.eup %2327 }
 0x38c   : > { %v1066_v7 = vmul.f32 %v2328_v6, %v2326_v4 }
 0x38e   : > { %v1067_v18 = vpack.c.bf16 %v1066_v7, %v1066_v7 }
 0x390   : > { %2198 = vst [vmem:[%s2541_s16 + $0x8] sm:$0xf] %v1067_v18  ;;  %1140 = vmatmul.mubr.bf16.vlgmr.msra.gmra.mrb[20].mxu0 %v1067_v18  ;;  %1181 = vmatmul.mubr.bf16.vlgmr.msra.gmra.mrb[20].mxu1 %v1067_v18 }
 0x391   : > { %1302 = vmatprep.mubr.bf16.mxu0 %v3112_v25  ;;  %1355 = vmatprep.mubr.bf16.mxu1 %v3112_v25 }
 0x392   : > { %1271 = vmatpush1.bf16.msra.mxu0 %v1226_v21  ;;  %1324 = vmatpush1.bf16.msra.mxu1 %v1228_v32 }
 0x393   : > { %1272 = vmatprep.subr.bf16.mxu0 %v1231_v5  ;;  %1325 = vmatprep.subr.bf16.mxu1 %v1233_v8  ;;  %v2831_v8 = vld [vmem:[#allocation4 + $0x100] sm:$0xff] }
 0x396   : > { %1273 = vmatpush1.bf16.msra.mxu0 %v1230_v9  ;;  %1326 = vmatpush1.bf16.msra.mxu1 %v1232_v10  ;;  %v2833_v9 = vld [vmem:[#allocation4 + $0x110] sm:$0xff]  ;;  %v2835_v10 = vld [vmem:[#allocation4 + $0x128] sm:$0xff] }
 0x397   : > { %1274 = vmatprep.subr.bf16.mxu0 %v1235_v11  ;;  %1327 = vmatprep.subr.bf16.mxu1 %v1237_v12  ;;  %v2279_v11 = vld [vmem:[%s2541_s16] sm:$0xff]   ;;  %v2838_v12 = vld [vmem:[#allocation4 + $0x138] sm:$0xff] }
 0x39a   : > { %1275 = vmatpush1.bf16.msra.mxu0 %v1234_v26  ;;  %1328 = vmatpush1.bf16.msra.mxu1 %v1236_v27  ;;  %v2846_v26 = vld [vmem:[#allocation4 + $0x130] sm:$0xff]  ;;  %v2850_v27 = vld [vmem:[#allocation4 + $0x148] sm:$0xff] }
 0x39b   : > { %1276 = vmatprep.subr.bf16.mxu0 %v1239_v37  ;;  %1329 = vmatprep.subr.bf16.mxu1 %v1241_v38  ;;  %v2852_v37 = vld [vmem:[#allocation4 + $0x158] sm:$0xff] }
 0x39e   : > { %1277 = vmatpush1.bf16.msra.mxu0 %v1238_v28  ;;  %1330 = vmatpush1.bf16.msra.mxu1 %v1240_v30  ;;  %v2859_v28 = vld [vmem:[#allocation4 + $0x140] sm:$0xff]  ;;  %v2861_v30 = vld [vmem:[#allocation4 + $0x150] sm:$0xff] }
 0x39f   : > { %1278 = vmatprep.subr.bf16.mxu0 %v1243_v13  ;;  %1331 = vmatprep.subr.bf16.mxu1 %v1245_v15  ;;  %v2863_v13 = vld [vmem:[#allocation4 + $0x168] sm:$0xff]  ;;  %v2865_v15 = vld [vmem:[#allocation4 + $0x178] sm:$0xff] }
 0x3a2   : > { %1279 = vmatpush1.bf16.msra.mxu0 %v1242_v16  ;;  %1332 = vmatpush1.bf16.msra.mxu1 %v1244_v17  ;;  %v2871_v16 = vld [vmem:[#allocation4 + $0x160] sm:$0xff]  ;;  %v2873_v17 = vld [vmem:[#allocation4 + $0x170] sm:$0xff] }
 0x3a3   : > { %1280 = vmatprep.subr.bf16.mxu0 %v1247_v31  ;;  %1333 = vmatprep.subr.bf16.mxu1 %v1249_v14  ;;  %v2875_v31 = vld [vmem:[#allocation4 + $0x188] sm:$0xff]  ;;  %v2877_v14 = vld [vmem:[#allocation4 + $0x198] sm:$0xff] }
 0x3a6   : > { %1281 = vmatpush1.bf16.msra.mxu0 %v1246_v33  ;;  %1334 = vmatpush1.bf16.msra.mxu1 %v1248_v29  ;;  %v2885_v33 = vld [vmem:[#allocation4 + $0x180] sm:$0xff]  ;;  %v2887_v29 = vld [vmem:[#allocation4 + $0x190] sm:$0xff] }
 0x3a7   : > { %1282 = vmatprep.subr.bf16.mxu0 %v1251_v24  ;;  %1335 = vmatprep.subr.bf16.mxu1 %v1253_v34  ;;  %v2889_v24 = vld [vmem:[#allocation4 + $0x1a8] sm:$0xff]  ;;  %v2891_v34 = vld [vmem:[#allocation4 + $0x1b8] sm:$0xff] }
 0x3aa   : > { %1283 = vmatpush1.bf16.msra.mxu0 %v1250_v35  ;;  %1336 = vmatpush1.bf16.msra.mxu1 %v1252_v36  ;;  %v2897_v35 = vld [vmem:[#allocation4 + $0x1a0] sm:$0xff]  ;;  %v2899_v36 = vld [vmem:[#allocation4 + $0x1b0] sm:$0xff] }
 0x3ab   : > { %1284 = vmatprep.subr.bf16.mxu0 %v1255_v39  ;;  %1337 = vmatprep.subr.bf16.mxu1 %v1257_v48  ;;  %v2901_v39 = vld [vmem:[#allocation4 + $0x1c8] sm:$0xff]  ;;  %v2903_v48 = vld [vmem:[#allocation4 + $0x1d8] sm:$0xff] }
 0x3ae   : > { %1285 = vmatpush1.bf16.msra.mxu0 %v1254_v40  ;;  %1338 = vmatpush1.bf16.msra.mxu1 %v1256_v41  ;;  %v2909_v40 = vld [vmem:[#allocation4 + $0x1c0] sm:$0xff]  ;;  %v2911_v41 = vld [vmem:[#allocation4 + $0x1d0] sm:$0xff] }
 0x3af   : > { %1434 = vmatprep.subr.bf16.mxu0 %v2819_v42  ;;  %1475 = vmatprep.subr.bf16.mxu1 %v2821_v43 }
 0x3b1   : > { %1303 = vmatmul.mubr.bf16.vlgmr.msra.gmra.mrb[24].mxu0 %v2279_v11  ;;  %1356 = vmatmul.mubr.bf16.vlgmr.msra.gmra.mrb[24].mxu1 %v2279_v11 }
 0x3b2   : > { %1435 = vmatpush1.bf16.msra.mxu0 %v2831_v8  ;;  %1476 = vmatpush1.bf16.msra.mxu1 %v2833_v9 }
 0x3b3   : > { %1436 = vmatprep.subr.bf16.mxu0 %v2835_v10  ;;  %1477 = vmatprep.subr.bf16.mxu1 %v2838_v12 }
 0x3b4   : > { %1312 = vmatprep.mubr.bf16.mxu0 %v3112_v25  ;;  %1365 = vmatprep.mubr.bf16.mxu1 %v3112_v25 }
 0x3b6   : > { %1478 = vmatpush1.bf16.msra.mxu1 %v2846_v26 }
 0x3b7   : > { %1479 = vmatprep.subr.bf16.mxu1 %v2852_v37 }
 0x3ba   : > { %1480 = vmatpush1.bf16.msra.mxu1 %v2861_v30 }
 0x3bb   : > { %1481 = vmatprep.subr.bf16.mxu1 %v2865_v15 }
 0x3be   : > { %1482 = vmatpush1.bf16.msra.mxu1 %v2873_v17 }
 0x3bf   : > { %1483 = vmatprep.subr.bf16.mxu1 %v2877_v14 }
 0x3c2   : > { %1484 = vmatpush1.bf16.msra.mxu1 %v2887_v29 }
 0x3c3   : > { %1485 = vmatprep.subr.bf16.mxu1 %v2891_v34 }
 0x3c6   : > { %1486 = vmatpush1.bf16.msra.mxu1 %v2899_v36 }
 0x3c7   : > { %1487 = vmatprep.subr.bf16.mxu1 %v2903_v48 }
 0x3ca   : > { %1488 = vmatpush1.bf16.msra.mxu1 %v2911_v41 }
 0x463   : > { %v1141_v44 = vpop.f32.mrb[20].mxu0  ;;  %v1182_v45 = vpop.f32.mrb[20].mxu1 }
 0x464   : > { %v1189_v46 = vadd.f32 %v1141_v44, %v2721_v22  ;;  %v1191_v47 = vadd.f32 %v1182_v45, %v2723_v23  ;;  %v1143_v49 = vpop.f32.mrb[21].mxu0  ;;  %v1184_v50 = vpop.f32.mrb[21].mxu1  ;;  %v2913_v44 = vld [vmem:[#allocation4 + $0x1e8] sm:$0xff]  ;;  %v2915_v45 = vld [vmem:[#allocation4 + $0x1f8] sm:$0xff] }
 0x465   : > { %v1190_v52 = vadd.f32 %v1143_v49, %v3113_v51  ;;  %v1192_v54 = vadd.f32 %v1184_v50, %v3114_v53  ;;  %v1145_v55 = vpop.f32.mrb[22].mxu0  ;;  %v1186_v56 = vpop.f32.mrb[22].mxu1  ;;  %1489 = vmatprep.subr.bf16.mxu1 %v2915_v45  ;;  %v2923_v49 = vld [vmem:[#allocation4 + $0x1f0] sm:$0xff] }
 0x466   : > { %v2199_v57 = vmul.f32 -1.442695, %v1189_v46  ;;  %v1146_v58 = vpop.f32.mrb[23].mxu0  ;;  %v1187_v59 = vpop.f32.mrb[23].mxu1  ;;  %v1393_v46 = vld [vmem:[#allocation5 + $0x8] sm:$0xff]  ;;  %1490 = vmatpush1.bf16.msra.mxu1 %v2923_v49 }
 0x467   : > { %v2200_v60 = vmul.f32 -1.442695, %v1190_v52  ;;  %v2201_v61 = vmul.f32 -1.442695, %v1192_v54  ;;  %v1400_v50 = vpack.c.bf16 %v1393_v46, %v1393_v46  ;;  %1623 = vmatprep.subr.bf16.mxu1 %v2821_v43 }
 0x468   : > { %2329 = vpow2.f32 %v2199_v57 }
 0x469   : > { %2331 = vpow2.f32 %v2200_v60 }
 0x46a   : > { %2333 = vpow2.f32 %v2201_v61 }
 0x46b   : > { %2335 = vtanh.f32 %v1191_v47  ;;  %v2921_v47 = vld [vmem:[#allocation4 + $0x1e0] sm:$0xff] }
 0x472   : > { %v2330_v62 = vpop.eup %2329 }
 0x473   : > { %v2332_v63 = vpop.eup %2331  ;;  %v1196_v22 = vadd.f32 1.0, %v2330_v62 }
 0x474   : > { %v1202_v23 = vadd.f32 1.0, %v2332_v63  ;;  %v2334_v0 = vpop.eup %2333 }
 0x475   : > { %2337 = vrcp.f32 %v1196_v22  ;;  %v2336_v1 = vpop.eup %2335  ;;  %v1209_v7 = vadd.f32 1.0, %v2334_v0 }
 0x476   : > { %2339 = vrcp.f32 %v1202_v23 }
 0x477   : > { %2341 = vrcp.f32 %v1209_v7 }
 0x47f   : > { %v2338_v2 = vpop.eup %2337 }
 0x480   : > { %v2340_v4 = vpop.eup %2339  ;;  %v1213_v6 = vmul.f32 %v2338_v2, %v2336_v1 }
 0x481   : > { %v1212_v18 = vmul.f32 %v2340_v4, %v2813_v3  ;;  %v2342_v20 = vpop.eup %2341  ;;  %v2844_v3 = vld [vmem:[#allocation4 + $0x120] sm:$0xff] }
 0x482   : > { %1437 = vmatpush1.bf16.msra.mxu0 %v2844_v3 }
 0x483   : > { %v1214_v19 = vadd.f32 %v1213_v6, %v1212_v18  ;;  %1438 = vmatprep.subr.bf16.mxu0 %v2850_v27 }
 0x484   : > { %v1304_v51 = vpop.f32.mrb[24].mxu0  ;;  %v1357_v52 = vpop.f32.mrb[24].mxu1 }
 0x485   : > { %2343 = vtanh.f32 %v1214_v19  ;;  %1221 = vst [vmem:[#allocation6] sm:$0xff] %v1214_v19  ;;  %v1306_v53 = vpop.f32.mrb[25].mxu0  ;;  %v1359_v54 = vpop.f32.mrb[25].mxu1 }
 0x486   : > { %1439 = vmatpush1.bf16.msra.mxu0 %v2859_v28  ;;  %v2963_v55 = vpop.f32.mrb[26].mxu0  ;;  %v2965_v56 = vpop.f32.mrb[26].mxu1 }
 0x487   : > { %1440 = vmatprep.subr.bf16.mxu0 %v2863_v13  ;;  %v2967_v57 = vpop.f32.mrb[27].mxu0  ;;  %v2969_v58 = vpop.f32.mrb[27].mxu1 }
 0x48a   : > { %1441 = vmatpush1.bf16.msra.mxu0 %v2871_v16 }
 0x48b   : > { %1442 = vmatprep.subr.bf16.mxu0 %v2875_v31 }
 0x48e   : > { %1443 = vmatpush1.bf16.msra.mxu0 %v2885_v33 }
 0x48f   : > { %v2344_v21 = vpop.eup %2343  ;;  %1444 = vmatprep.subr.bf16.mxu0 %v2889_v24 }
 0x490   : > { %v1216_v32 = vmul.f32 %v2344_v21, %v2342_v20 }
 0x492   : > { %v1217_v5 = vpack.c.bf16 %v1216_v32, %v1216_v32  ;;  %1220 = vst [vmem:[#allocation5] sm:$0xff] %v1216_v32  ;;  %1445 = vmatpush1.bf16.msra.mxu0 %v2897_v35 }
 0x493   : > { %1446 = vmatprep.subr.bf16.mxu0 %v2901_v39 }
 0x494   : > { %2202 = vst [vmem:[%s2541_s16 + $0xc] sm:$0xf] %v1217_v5 }
 0x496   : > { %1447 = vmatpush1.bf16.msra.mxu0 %v2909_v40 }
 0x497   : > { %1448 = vmatprep.subr.bf16.mxu0 %v2913_v44 }
 0x49a   : > { %1449 = vmatpush1.bf16.msra.mxu0 %v2921_v47 }
 0x49b   : > { %v2280_v38 = vld [vmem:[%s2541_s16 + $0x8] sm:$0xff]   ;;  %1582 = vmatprep.subr.bf16.mxu0 %v2819_v42 }
 0x49c   : > { %1313 = vmatmul.mubr.bf16.gmra.mrb[28].mxu0 %v2280_v38  ;;  %1366 = vmatmul.mubr.bf16.gmra.mrb[28].mxu1 %v2280_v38 }
 0x49d   : > { %1466 = vmatprep.mubr.bf16.mxu0 %v3112_v25  ;;  %1507 = vmatprep.mubr.bf16.mxu1 %v3112_v25 }
 0x4a4   : > { %1467 = vmatmul.mubr.bf16.vlgmr.msra.gmra.mrb[32].mxu0 %v1400_v50  ;;  %1508 = vmatmul.mubr.bf16.vlgmr.msra.gmra.mrb[32].mxu1 %v1400_v50 }
 0x4a5   : > { %1583 = vmatpush1.bf16.msra.mxu0 %v2831_v8  ;;  %1624 = vmatpush1.bf16.msra.mxu1 %v2833_v9 }
 0x4a6   : > { %1584 = vmatprep.subr.bf16.mxu0 %v2835_v10  ;;  %1625 = vmatprep.subr.bf16.mxu1 %v2838_v12 }
 0x4a7   : > { %1614 = vmatprep.mubr.bf16.mxu0 %v3112_v25  ;;  %1655 = vmatprep.mubr.bf16.mxu1 %v3112_v25 }
 0x4a9   : > { %1585 = vmatpush1.bf16.msra.mxu0 %v2844_v3  ;;  %1626 = vmatpush1.bf16.msra.mxu1 %v2846_v26 }
 0x4aa   : > { %1586 = vmatprep.subr.bf16.mxu0 %v2850_v27  ;;  %1627 = vmatprep.subr.bf16.mxu1 %v2852_v37 }
 0x4ad   : > { %1587 = vmatpush1.bf16.msra.mxu0 %v2859_v28  ;;  %1628 = vmatpush1.bf16.msra.mxu1 %v2861_v30 }
 0x4ae   : > { %1588 = vmatprep.subr.bf16.mxu0 %v2863_v13  ;;  %1629 = vmatprep.subr.bf16.mxu1 %v2865_v15 }
 0x4b1   : > { %1589 = vmatpush1.bf16.msra.mxu0 %v2871_v16  ;;  %1630 = vmatpush1.bf16.msra.mxu1 %v2873_v17 }
 0x4b2   : > { %1590 = vmatprep.subr.bf16.mxu0 %v2875_v31  ;;  %1631 = vmatprep.subr.bf16.mxu1 %v2877_v14 }
 0x4b5   : > { %1591 = vmatpush1.bf16.msra.mxu0 %v2885_v33  ;;  %1632 = vmatpush1.bf16.msra.mxu1 %v2887_v29 }
 0x4b6   : > { %1592 = vmatprep.subr.bf16.mxu0 %v2889_v24  ;;  %1633 = vmatprep.subr.bf16.mxu1 %v2891_v34 }
 0x4b9   : > { %1593 = vmatpush1.bf16.msra.mxu0 %v2897_v35  ;;  %1634 = vmatpush1.bf16.msra.mxu1 %v2899_v36 }
 0x4ba   : > { %1594 = vmatprep.subr.bf16.mxu0 %v2901_v39  ;;  %1635 = vmatprep.subr.bf16.mxu1 %v2903_v48 }
 0x4bd   : > { %1595 = vmatpush1.bf16.msra.mxu0 %v2909_v40  ;;  %1636 = vmatpush1.bf16.msra.mxu1 %v2911_v41 }
 0x4be   : > { %1596 = vmatprep.subr.bf16.mxu0 %v2913_v44  ;;  %1637 = vmatprep.subr.bf16.mxu1 %v2915_v45 }
 0x4c1   : > { %1597 = vmatpush1.bf16.msra.mxu0 %v2921_v47  ;;  %1638 = vmatpush1.bf16.msra.mxu1 %v2923_v49 }
 0x4c2   : > { %1730 = vmatprep.subr.bf16.mxu0 %v2819_v42  ;;  %1771 = vmatprep.subr.bf16.mxu1 %v2821_v43 }
 0x56f   : > { %v2971_v59 = vpop.f32.mrb[28].mxu0  ;;  %v2973_v60 = vpop.f32.mrb[28].mxu1 }
 0x570   : > { %v2975_v61 = vpop.f32.mrb[29].mxu0  ;;  %v2977_v62 = vpop.f32.mrb[29].mxu1 }
 0x571   : > { %v2979_v63 = vpop.f32.mrb[30].mxu0  ;;  %v2981_v22 = vpop.f32.mrb[30].mxu1 }
 0x572   : > { %3115 = vst [vmem:[#allocation20_spill] sm:$0xff] %v2981_v22  ;;  %v2983_v23 = vpop.f32.mrb[31].mxu0  ;;  %v2985_v0 = vpop.f32.mrb[31].mxu1 }
 0x573   : > { %3116 = vst [vmem:[#allocation21_spill] sm:$0xff] %v2983_v23  ;;  %3117 = vst [vmem:[#allocation22_spill] sm:$0xff] %v2985_v0 }
 0x577   : > { %v1468_v1 = vpop.f32.mrb[32].mxu0  ;;  %v1509_v2 = vpop.f32.mrb[32].mxu1 }
 0x578   : > { %v1516_v4 = vadd.f32 %v1468_v1, %v1304_v51  ;;  %v1518_v6 = vadd.f32 %v1509_v2, %v1357_v52  ;;  %v1470_v7 = vpop.f32.mrb[33].mxu0  ;;  %v1511_v18 = vpop.f32.mrb[33].mxu1 }
 0x579   : > { %v1517_v19 = vadd.f32 %v1470_v7, %v1306_v53  ;;  %v1519_v20 = vadd.f32 %v1511_v18, %v1359_v54  ;;  %v1472_v21 = vpop.f32.mrb[34].mxu0  ;;  %v1513_v32 = vpop.f32.mrb[34].mxu1  ;;  %v1395_v54 = vld [vmem:[#allocation6 + $0x8] sm:$0xff] }
 0x57a   : > { %v2205_v5 = vmul.f32 -1.442695, %v1516_v4  ;;  %v1473_v11 = vpop.f32.mrb[35].mxu0  ;;  %v1514_v38 = vpop.f32.mrb[35].mxu1 }
 0x57b   : > { %v2206_v46 = vmul.f32 -1.442695, %v1517_v19  ;;  %v2207_v50 = vmul.f32 -1.442695, %v1519_v20 }
 0x57c   : > { %2345 = vpow2.f32 %v2205_v5 }
 0x57d   : > { %2347 = vpow2.f32 %v2206_v46 }
 0x57e   : > { %2349 = vpow2.f32 %v2207_v50 }
 0x57f   : > { %2351 = vtanh.f32 %v1518_v6 }
 0x586   : > { %v2346_v23 = vpop.eup %2345 }
 0x587   : > { %v2348_v22 = vpop.eup %2347  ;;  %v1523_v0 = vadd.f32 1.0, %v2346_v23 }
 0x588   : > { %v1529_v51 = vadd.f32 1.0, %v2348_v22  ;;  %v2350_v52 = vpop.eup %2349 }
 0x589   : > { %2353 = vrcp.f32 %v1523_v0  ;;  %v2352_v53 = vpop.eup %2351  ;;  %v1536_v7 = vadd.f32 1.0, %v2350_v52 }
 0x58a   : > { %2355 = vrcp.f32 %v1529_v51 }
 0x58b   : > { %2357 = vrcp.f32 %v1536_v7 }
 0x593   : > { %v2354_v1 = vpop.eup %2353 }
 0x594   : > { %v2356_v2 = vpop.eup %2355  ;;  %v1540_v4 = vmul.f32 %v2354_v1, %v2352_v53 }
 0x595   : > { %v1539_v18 = vmul.f32 %v2356_v2, %v1395_v54  ;;  %v2358_v23 = vpop.eup %2357 }
 0x597   : > { %v2987_v19 = vadd.f32 %v1540_v4, %v1539_v18 }
 0x599   : > { %2359 = vtanh.f32 %v2987_v19 }
 0x5a3   : > { %v2360_v20 = vpop.eup %2359 }
 0x5a4   : > { %v1543_v6 = vmul.f32 %v2360_v20, %v2358_v23 }
 0x5a6   : > { %v1544_v22 = vpack.c.bf16 %v1543_v6, %v1543_v6 }
 0x5a8   : > { %1615 = vmatmul.mubr.bf16.vlgmr.msra.gmra.mrb[36].mxu0 %v1544_v22  ;;  %1545 = vst [vmem:[%s2541_s16] sm:$0xf] %v1544_v22  ;;  %1656 = vmatmul.mubr.bf16.vlgmr.msra.gmra.mrb[36].mxu1 %v1544_v22 }
 0x5a9   : > { %1731 = vmatpush1.bf16.msra.mxu0 %v2831_v8  ;;  %1772 = vmatpush1.bf16.msra.mxu1 %v2833_v9 }
 0x5aa   : > { %1732 = vmatprep.subr.bf16.mxu0 %v2835_v10  ;;  %1773 = vmatprep.subr.bf16.mxu1 %v2838_v12 }
 0x5ab   : > { %1762 = vmatprep.mubr.bf16.mxu0 %v3112_v25  ;;  %1803 = vmatprep.mubr.bf16.mxu1 %v3112_v25 }
 0x5ad   : > { %1733 = vmatpush1.bf16.msra.mxu0 %v2844_v3  ;;  %1774 = vmatpush1.bf16.msra.mxu1 %v2846_v26 }
 0x5ae   : > { %1734 = vmatprep.subr.bf16.mxu0 %v2850_v27  ;;  %1775 = vmatprep.subr.bf16.mxu1 %v2852_v37 }
 0x5b1   : > { %1735 = vmatpush1.bf16.msra.mxu0 %v2859_v28  ;;  %1776 = vmatpush1.bf16.msra.mxu1 %v2861_v30 }
 0x5b2   : > { %1736 = vmatprep.subr.bf16.mxu0 %v2863_v13  ;;  %1777 = vmatprep.subr.bf16.mxu1 %v2865_v15 }
 0x5b5   : > { %1737 = vmatpush1.bf16.msra.mxu0 %v2871_v16  ;;  %1778 = vmatpush1.bf16.msra.mxu1 %v2873_v17 }
 0x5b6   : > { %1738 = vmatprep.subr.bf16.mxu0 %v2875_v31  ;;  %1779 = vmatprep.subr.bf16.mxu1 %v2877_v14 }
 0x5b9   : > { %1739 = vmatpush1.bf16.msra.mxu0 %v2885_v33  ;;  %1780 = vmatpush1.bf16.msra.mxu1 %v2887_v29 }
 0x5ba   : > { %1740 = vmatprep.subr.bf16.mxu0 %v2889_v24  ;;  %1781 = vmatprep.subr.bf16.mxu1 %v2891_v34 }
 0x5bd   : > { %1741 = vmatpush1.bf16.msra.mxu0 %v2897_v35  ;;  %1782 = vmatpush1.bf16.msra.mxu1 %v2899_v36 }
 0x5be   : > { %1742 = vmatprep.subr.bf16.mxu0 %v2901_v39  ;;  %1783 = vmatprep.subr.bf16.mxu1 %v2903_v48 }
 0x5c1   : > { %1743 = vmatpush1.bf16.msra.mxu0 %v2909_v40  ;;  %1784 = vmatpush1.bf16.msra.mxu1 %v2911_v41 }
 0x5c2   : > { %1744 = vmatprep.subr.bf16.mxu0 %v2913_v44  ;;  %1785 = vmatprep.subr.bf16.mxu1 %v2915_v45 }
 0x5c5   : > { %1745 = vmatpush1.bf16.msra.mxu0 %v2921_v47  ;;  %1786 = vmatpush1.bf16.msra.mxu1 %v2923_v49 }
 0x5c6   : > { %1878 = vmatprep.subr.bf16.mxu0 %v2819_v42  ;;  %1919 = vmatprep.subr.bf16.mxu1 %v2821_v43 }
 0x67b   : > { %v1616_v0 = vpop.f32.mrb[36].mxu0  ;;  %v1657_v21 = vpop.f32.mrb[36].mxu1 }
 0x67c   : > { %v1664_v32 = vadd.f32 %v1616_v0, %v2963_v55  ;;  %v1666_v5 = vadd.f32 %v1657_v21, %v2965_v56  ;;  %v1618_v11 = vpop.f32.mrb[37].mxu0  ;;  %v1659_v38 = vpop.f32.mrb[37].mxu1 }
 0x67d   : > { %v1665_v46 = vadd.f32 %v1618_v11, %v2967_v57  ;;  %v1667_v50 = vadd.f32 %v1659_v38, %v2969_v58  ;;  %v1620_v51 = vpop.f32.mrb[38].mxu0  ;;  %v1661_v52 = vpop.f32.mrb[38].mxu1 }
 0x67e   : > { %v2208_v53 = vmul.f32 -1.442695, %v1664_v32  ;;  %v1621_v54 = vpop.f32.mrb[39].mxu0  ;;  %v1662_v1 = vpop.f32.mrb[39].mxu1  ;;  %v3120_v51 = vld [vmem:[#allocation22_spill] sm:$0xff] }
 0x67f   : > { %v2209_v42 = vmul.f32 -1.442695, %v1665_v46  ;;  %v2210_v43 = vmul.f32 -1.442695, %v1667_v50  ;;  %v3119_v46 = vld [vmem:[#allocation21_spill] sm:$0xff] }
 0x680   : > { %2361 = vpow2.f32 %v2208_v53 }
 0x681   : > { %2363 = vpow2.f32 %v2209_v42 }
 0x682   : > { %2365 = vpow2.f32 %v2210_v43 }
 0x683   : > { %2367 = vtanh.f32 %v1666_v5 }
 0x68a   : > { %v2362_v2 = vpop.eup %2361 }
 0x68b   : > { %v2364_v4 = vpop.eup %2363  ;;  %v1671_v55 = vadd.f32 1.0, %v2362_v2 }
 0x68c   : > { %v1677_v56 = vadd.f32 1.0, %v2364_v4  ;;  %v2366_v57 = vpop.eup %2365 }
 0x68d   : > { %2369 = vrcp.f32 %v1671_v55  ;;  %v2368_v58 = vpop.eup %2367  ;;  %v1684_v20 = vadd.f32 1.0, %v2366_v57 }
 0x68e   : > { %2371 = vrcp.f32 %v1677_v56 }
 0x68f   : > { %2373 = vrcp.f32 %v1684_v20 }
 0x697   : > { %v2370_v7 = vpop.eup %2369 }
 0x698   : > { %v2372_v18 = vpop.eup %2371  ;;  %v1688_v23 = vmul.f32 %v2370_v7, %v2368_v58 }
 0x699   : > { %v1687_v6 = vmul.f32 %v2372_v18, %v2987_v19  ;;  %v2374_v0 = vpop.eup %2373 }
 0x69b   : > { %v3030_v22 = vadd.f32 %v1688_v23, %v1687_v6 }
 0x69d   : > { %2375 = vtanh.f32 %v3030_v22 }
 0x6a7   : > { %v2376_v21 = vpop.eup %2375 }
 0x6a8   : > { %v1691_v32 = vmul.f32 %v2376_v21, %v2374_v0 }
 0x6aa   : > { %v1692_v5 = vpack.c.bf16 %v1691_v32, %v1691_v32 }
 0x6ac   : > { %2211 = vst [vmem:[%s2541_s16 + $0x4] sm:$0xf] %v1692_v5  ;;  %1763 = vmatmul.mubr.bf16.vlgmr.msra.gmra.mrb[40].mxu0 %v1692_v5  ;;  %1804 = vmatmul.mubr.bf16.vlgmr.msra.gmra.mrb[40].mxu1 %v1692_v5 }
 0x6ad   : > { %1879 = vmatpush1.bf16.msra.mxu0 %v2831_v8  ;;  %1920 = vmatpush1.bf16.msra.mxu1 %v2833_v9 }
 0x6ae   : > { %1880 = vmatprep.subr.bf16.mxu0 %v2835_v10  ;;  %1921 = vmatprep.subr.bf16.mxu1 %v2838_v12 }
 0x6af   : > { %1910 = vmatprep.mubr.bf16.mxu0 %v3112_v25  ;;  %1951 = vmatprep.mubr.bf16.mxu1 %v3112_v25 }
 0x6b1   : > { %1881 = vmatpush1.bf16.msra.mxu0 %v2844_v3  ;;  %1922 = vmatpush1.bf16.msra.mxu1 %v2846_v26 }
 0x6b2   : > { %1882 = vmatprep.subr.bf16.mxu0 %v2850_v27  ;;  %1923 = vmatprep.subr.bf16.mxu1 %v2852_v37 }
 0x6b5   : > { %1883 = vmatpush1.bf16.msra.mxu0 %v2859_v28  ;;  %1924 = vmatpush1.bf16.msra.mxu1 %v2861_v30 }
 0x6b6   : > { %1884 = vmatprep.subr.bf16.mxu0 %v2863_v13  ;;  %1925 = vmatprep.subr.bf16.mxu1 %v2865_v15 }
 0x6b9   : > { %1885 = vmatpush1.bf16.msra.mxu0 %v2871_v16  ;;  %1926 = vmatpush1.bf16.msra.mxu1 %v2873_v17 }
 0x6ba   : > { %1886 = vmatprep.subr.bf16.mxu0 %v2875_v31  ;;  %1927 = vmatprep.subr.bf16.mxu1 %v2877_v14 }
 0x6bd   : > { %1887 = vmatpush1.bf16.msra.mxu0 %v2885_v33  ;;  %1928 = vmatpush1.bf16.msra.mxu1 %v2887_v29 }
 0x6be   : > { %1888 = vmatprep.subr.bf16.mxu0 %v2889_v24  ;;  %1929 = vmatprep.subr.bf16.mxu1 %v2891_v34 }
 0x6c1   : > { %1889 = vmatpush1.bf16.msra.mxu0 %v2897_v35  ;;  %1930 = vmatpush1.bf16.msra.mxu1 %v2899_v36 }
 0x6c2   : > { %1890 = vmatprep.subr.bf16.mxu0 %v2901_v39  ;;  %1931 = vmatprep.subr.bf16.mxu1 %v2903_v48 }
 0x6c5   : > { %1891 = vmatpush1.bf16.msra.mxu0 %v2909_v40  ;;  %1932 = vmatpush1.bf16.msra.mxu1 %v2911_v41 }
 0x6c6   : > { %1892 = vmatprep.subr.bf16.mxu0 %v2913_v44  ;;  %1933 = vmatprep.subr.bf16.mxu1 %v2915_v45 }
 0x6c9   : > { %1893 = vmatpush1.bf16.msra.mxu0 %v2921_v47  ;;  %1934 = vmatpush1.bf16.msra.mxu1 %v2923_v49 }
 0x77f   : > { %v1764_v25 = vpop.f32.mrb[40].mxu0  ;;  %v1805_v8 = vpop.f32.mrb[40].mxu1 }
 0x780   : > { %v1812_v9 = vadd.f32 %v1764_v25, %v2971_v59  ;;  %v1814_v10 = vadd.f32 %v1805_v8, %v2973_v60  ;;  %v1766_v12 = vpop.f32.mrb[41].mxu0  ;;  %v1807_v3 = vpop.f32.mrb[41].mxu1  ;;  %v1996_v8 = vld [vmem:[#allocation5] sm:$0xff] (!%p2220_p6) }
 0x781   : > { %v1813_v26 = vadd.f32 %v1766_v12, %v2975_v61  ;;  %v1815_v27 = vadd.f32 %v1807_v3, %v2977_v62  ;;  %v1768_v37 = vpop.f32.mrb[42].mxu0  ;;  %v1809_v28 = vpop.f32.mrb[42].mxu1  ;;  %v3118_v62 = vld [vmem:[#allocation20_spill] sm:$0xff]  ;;  %1998 = vst [vmem:[%s3106_s7] sm:$0xff] (!%p2220_p6), %v1996_v8 }
 0x782   : > { %v2212_v30 = vmul.f32 -1.442695, %v1812_v9  ;;  %v1769_v13 = vpop.f32.mrb[43].mxu0  ;;  %v1810_v15 = vpop.f32.mrb[43].mxu1 }
 0x783   : > { %v2213_v16 = vmul.f32 -1.442695, %v1813_v26  ;;  %v2214_v17 = vmul.f32 -1.442695, %v1815_v27 }
 0x784   : > { %2377 = vpow2.f32 %v2212_v30 }
 0x785   : > { %2379 = vpow2.f32 %v2213_v16 }
 0x786   : > { %2381 = vpow2.f32 %v2214_v17 }
 0x787   : > { %2383 = vtanh.f32 %v1814_v10  ;;  %v2000_v10 = vld [vmem:[#allocation6] sm:$0xff] (!%p2220_p6) }
 0x788   : > { %2002 = vst [vmem:[%s3107_s8] sm:$0xff] (!%p2220_p6), %v2000_v10 }
 0x78e   : > { %v2378_v31 = vpop.eup %2377 }
 0x78f   : > { %v2380_v14 = vpop.eup %2379  ;;  %v1819_v33 = vadd.f32 1.0, %v2378_v31 }
 0x790   : > { %v1825_v29 = vadd.f32 1.0, %v2380_v14  ;;  %v2382_v24 = vpop.eup %2381 }
 0x791   : > { %2385 = vrcp.f32 %v1819_v33  ;;  %v2384_v34 = vpop.eup %2383  ;;  %v1832_v48 = vadd.f32 1.0, %v2382_v24 }
 0x792   : > { %2387 = vrcp.f32 %v1825_v29 }
 0x793   : > { %2389 = vrcp.f32 %v1832_v48 }
 0x79b   : > { %v2386_v35 = vpop.eup %2385 }
 0x79c   : > { %v2388_v36 = vpop.eup %2387  ;;  %v1836_v39 = vmul.f32 %v2386_v35, %v2384_v34 }
 0x79d   : > { %v1835_v40 = vmul.f32 %v2388_v36, %v3030_v22  ;;  %v2390_v44 = vpop.eup %2389 }
 0x79f   : > { %v1837_v41 = vadd.f32 %v1836_v39, %v1835_v40 }
 0x7a1   : > { %2391 = vtanh.f32 %v1837_v41 }
 0x7ab   : > { %v2392_v45 = vpop.eup %2391 }
 0x7ac   : > { %v1839_v47 = vmul.f32 %v2392_v45, %v2390_v44 }
 0x7ae   : > { %v1840_v49 = vpack.c.bf16 %v1839_v47, %v1839_v47 }
 0x7b0   : > { %2215 = vst [vmem:[%s2541_s16 + $0x8] sm:$0xf] %v1840_v49  ;;  %1911 = vmatmul.mubr.bf16.vlgmr.msra.gmra.mrb[44].mxu0 %v1840_v49  ;;  %1952 = vmatmul.mubr.bf16.vlgmr.msra.gmra.mrb[44].mxu1 %v1840_v49 }
 0x883   : > { %v1912_v59 = vpop.f32.mrb[44].mxu0  ;;  %v1953_v60 = vpop.f32.mrb[44].mxu1 }
 0x884   : > { %v1960_v61 = vadd.f32 %v1912_v59, %v2979_v63  ;;  %v1962_v19 = vadd.f32 %v1953_v60, %v3118_v62  ;;  %v1914_v11 = vpop.f32.mrb[45].mxu0  ;;  %v1955_v38 = vpop.f32.mrb[45].mxu1 }
 0x885   : > { %v1961_v50 = vadd.f32 %v1914_v11, %v3119_v46  ;;  %v1963_v52 = vadd.f32 %v1955_v38, %v3120_v51  ;;  %v1916_v53 = vpop.f32.mrb[46].mxu0  ;;  %v1957_v54 = vpop.f32.mrb[46].mxu1 }
 0x886   : > { %v2216_v1 = vmul.f32 -1.442695, %v1960_v61  ;;  %v1917_v42 = vpop.f32.mrb[47].mxu0  ;;  %v1958_v43 = vpop.f32.mrb[47].mxu1 }
 0x887   : > { %v2217_v2 = vmul.f32 -1.442695, %v1961_v50  ;;  %v2218_v4 = vmul.f32 -1.442695, %v1963_v52 }
 0x888   : > { %2393 = vpow2.f32 %v2216_v1 }
 0x889   : > { %2395 = vpow2.f32 %v2217_v2 }
 0x88a   : > { %2397 = vpow2.f32 %v2218_v4 }
 0x88b   : > { %2399 = vtanh.f32 %v1962_v19 }
 0x892   : > { %v2394_v55 = vpop.eup %2393 }
 0x893   : > { %v2396_v56 = vpop.eup %2395  ;;  %v1967_v63 = vadd.f32 1.0, %v2394_v55 }
 0x894   : > { %v1973_v57 = vadd.f32 1.0, %v2396_v56  ;;  %v2398_v58 = vpop.eup %2397 }
 0x895   : > { %2401 = vrcp.f32 %v1967_v63  ;;  %v2400_v7 = vpop.eup %2399  ;;  %v1980_v6 = vadd.f32 1.0, %v2398_v58 }
 0x896   : > { %2403 = vrcp.f32 %v1973_v57 }
 0x897   : > { %2405 = vrcp.f32 %v1980_v6 }
 0x89f   : > { %v2402_v18 = vpop.eup %2401 }
 0x8a0   : > { %v2404_v23 = vpop.eup %2403  ;;  %v1984_v20 = vmul.f32 %v2402_v18, %v2400_v7 }
 0x8a1   : > { %v1983_v22 = vmul.f32 %v2404_v23, %v1837_v41  ;;  %v2406_v21 = vpop.eup %2405 }
 0x8a3   : > { %v1985_v0 = vadd.f32 %v1984_v20, %v1983_v22 }
 0x8a5   : > { %2407 = vtanh.f32 %v1985_v0  ;;  %1991 = vst [vmem:[#allocation6 + $0x8] sm:$0xff] %v1985_v0 }
 0x8ac   : > { %v2001_v12 = vld [vmem:[#allocation6 + $0x8] sm:$0xff] (!%p2220_p6) }
 0x8ad   : > { %2003 = vst [vmem:[%s3107_s8 + $0x8] sm:$0xff] (!%p2220_p6), %v2001_v12 }
 0x8ae   : > { %1995 = sbr.rel (%p2220_p6) target bundleno = 2235 (0x8bb), region = 43 }
 0x8af   : > { %v2408_v32 = vpop.eup %2407 }
 0x8b0   : > { %v1987_v5 = vmul.f32 %v2408_v32, %v2406_v21 }
 0x8b2   : > { %v1988_v25 = vpack.c.bf16 %v1987_v5, %v1987_v5  ;;  %1990 = vst [vmem:[#allocation5 + $0x8] sm:$0xff] %v1987_v5 }
 0x8b4   : > { %2219 = vst [vmem:[%s2541_s16 + $0xc] sm:$0xf] %v1988_v25 }
 0x8b9   : > { %v1997_v9 = vld [vmem:[#allocation5 + $0x8] sm:$0xff] }
 0x8ba   : > { %1999 = vst [vmem:[%s3106_s7 + $0x8] sm:$0xff] %v1997_v9 }
 0x8bb PF: > { %s19_s29 = sadd.s32 1, %s2437_s29   ;;  %s3121_s27 = smov %s2433_s28 }
 0x8bc   : > { %p16_p7 = scmp.ge.s32.totalorder %s19_s29, 4   ;;  %s3122_s28 = smov %s3124_s30 }
 0x8be   :  { %18 = sbr.rel (!%p16_p7) target bundleno = 2 (0x2), region = 136 }

</bundles_post_ra>
